<compile_context>
chip_gen: v7x
topology: tpu7x:2x2x1
jax: 0.10.0
libtpu: 0.0.40
codegen_flags: <defaults>
</compile_context>

<pallas_src>
import functools

import jax
import jax.numpy as jnp
from jax import lax
from jax.experimental import pallas as pl
from jax.experimental.pallas import tpu as pltpu


# ----------------------------- fused kernel ----------------------------------

def _yblock_kernel(xw_ref,
                   w1_ref, s1_ref, b1_ref,
                   w2_ref, s2_ref, b2_ref,
                   pool_ref, wse1_ref, bse1_ref, wse2_ref, bse2_ref, bcast_ref,
                   w3_ref, s3_ref, b3_ref,
                   wsc_ref, ssc_ref, bsc_ref,
                   o_ref,
                   h1p_ref,
                   *, W, Ho, Wo, cout, lane_off, row_groups, tap_starts,
                   sc_start, inv_hw):
    # ---- conv1 (1x1) + bn1 + relu, in "wide" (rows, W*C) layout --------------
    h1 = jnp.dot(xw_ref[0], w1_ref[...], preferred_element_type=jnp.float32)
    h1 = jnp.maximum(h1 * s1_ref[...] + b1_ref[...], 0.0)          # (H, W*cout)

    # ---- scatter conv1 rows into the zero-padded, stride-deinterleaved scratch
    # (rows were pre-ordered by stride phase in the wrapper, so each phase is a
    #  single static contiguous slice write).
    h1p_ref[...] = jnp.zeros_like(h1p_ref)
    for (src, cnt, dst) in row_groups:                              # static plan
        h1p_ref[pl.ds(dst, cnt), pl.ds(lane_off, W * cout)] = h1[src:src + cnt, :]

    # ---- conv2 (3x3 grouped, dilated, strided) + bn2 + relu ------------------
    # Column taps, column stride and groups are folded into w2_ref[kh]; the row
    # stride is a static contiguous slice of the phase-deinterleaved scratch.
    acc = jnp.zeros((Ho, Wo * cout), jnp.float32)
    for kh in range(3):
        lhs = h1p_ref[pl.ds(tap_starts[kh], Ho), :]                 # (Ho, Wp*cout)
        acc = acc + jnp.dot(lhs, w2_ref[kh], preferred_element_type=jnp.float32)
    y2 = jnp.maximum(acc * s2_ref[...] + b2_ref[...], 0.0)          # (Ho, Wo*cout)

    # ---- SE: global avg pool + FC/ReLU + FC/Sigmoid + channel gate -----------
    colsum = jnp.sum(y2, axis=0, keepdims=True)                     # (1, Wo*cout)
    m = jnp.dot(colsum, pool_ref[...],
                preferred_element_type=jnp.float32) * inv_hw        # (1, cout)
    hse = jnp.maximum(
        jnp.dot(m, wse1_ref[...], preferred_element_type=jnp.float32)
        + bse1_ref[...], 0.0)
    gate = jax.nn.sigmoid(
        jnp.dot(hse, wse2_ref[...], preferred_element_type=jnp.float32)
        + bse2_ref[...])                                            # (1, cout)
    gate_w = jnp.dot(gate, bcast_ref[...],
                     preferred_element_type=jnp.float32)            # (1, Wo*cout)
    z = y2 * gate_w

    # ---- conv3 (1x1) + bn3 ---------------------------------------------------
    y3 = jnp.dot(z, w3_ref[...], preferred_element_type=jnp.float32)
    y3 = y3 * s3_ref[...] + b3_ref[...]

    # ---- shortcut: 1x1 stride-s conv + bn (identity weights when no shortcut)
    xs = xw_ref[0, pl.ds(sc_start, Ho), :]                          # (Ho, W*cin)
    sc = jnp.dot(xs, wsc_ref[...], preferred_element_type=jnp.float32)
    sc = sc * ssc_ref[...] + bsc_ref[...]

    # ---- residual add + relu; lane-dense (Ho, Wo*cout) store -----------------
    o_ref[0] = jnp.maximum(y3 + sc, 0.0)


# ------------------------ static row / stride planning ------------------------

def _row_plan(H, d, s):
    """Static plan for handling the 3x3 conv's row padding + stride in-kernel."""
    Hp = H + 2 * d                      # padded height
    Hd = -(-Hp // s)                    # rows per stride-phase in the scratch
    Ho = (H - 1) // s + 1               # output height
    perm, groups, src = [], [], 0
    for p in range(s):                  # group input rows by (d + h) % s
        hs = [h for h in range(H) if (d + h) % s == p]
        perm += hs
        if hs:
            groups.append((src, len(hs), p * Hd + (d + hs[0]) // s))
            src += len(hs)
    tap_starts = tuple(((kh * d) % s) * Hd + (kh * d) // s for kh in range(3))
    p0 = d % s                          # phase that holds rows 0, s, 2s, ...
    sc_start = sum(len([h for h in range(H) if (d + h) % s == p]) for p in range(p0))
    return perm, tuple(groups), tap_starts, sc_start, Hp, Hd, Ho


# ----------------------------- forward wrapper --------------------------------

def yblock_forward(x_nchw, kp, *, dilation, stride):
    N, cin, H, W = x_nchw.shape
    cout = kp["bcast"].shape[0]
    d, s = dilation, stride
    perm, row_groups, tap_starts, sc_start, Hp, Hd, Ho = _row_plan(H, d, s)
    Wo = (W - 1) // s + 1

    # Input-side glue only (intermediates never leave VMEM):
    # NCHW -> NHWC -> stride-phase row order -> wide (rows, W*Cin).
    x = jnp.transpose(x_nchw, (0, 2, 3, 1))
    x = jnp.take(x, jnp.asarray(perm, jnp.int32), axis=1)
    xw = x.reshape(N, H, W * cin)

    kernel = functools.partial(
        _yblock_kernel, W=W, Ho=Ho, Wo=Wo, cout=cout,
        lane_off=d * cout, row_groups=row_groups, tap_starts=tap_starts,
        sc_start=sc_start, inv_hw=1.0 / (Ho * Wo))

    ins = [xw, kp["w1w"], kp["s1w"], kp["b1w"],
           kp["w2f"], kp["s2w"], kp["b2w"],
           kp["pool"], kp["w_se1"], kp["b_se1"], kp["w_se2"], kp["b_se2"],
           kp["bcast"],
           kp["w3w"], kp["s3w"], kp["b3w"],
           kp["wscf"], kp["sscw"], kp["bscw"]]

    def _full(a):
        nd = a.ndim
        return pl.BlockSpec(a.shape, lambda n, _nd=nd: (0,) * _nd)

    in_specs = ([pl.BlockSpec((1, H, W * cin), lambda n: (n, 0, 0))]
                + [_full(a) for a in ins[1:]])

    out = pl.pallas_call(
        kernel,
        out_shape=jax.ShapeDtypeStruct((N, Ho, Wo * cout), jnp.float32),
        grid=(N,),
        in_specs=in_specs,
        out_specs=pl.BlockSpec((1, Ho, Wo * cout), lambda n: (n, 0, 0)),
        scratch_shapes=[pltpu.VMEM((s * Hd, Hp * cout), jnp.float32)],
        compiler_params=pltpu.CompilerParams(
            dimension_semantics=("parallel",),
            vmem_limit_bytes=32 * 1024 * 1024),
    )(*ins)

    # metadata reshape + final layout transpose back to NCHW
    return jnp.transpose(out.reshape(N, Ho, Wo, cout), (0, 3, 1, 2))


# --------------------- parameter prep (done once, outside jit) ----------------

def prepare_params(p, *, H, W, cin, cout, dilation, stride):
    """Fold BN, stride, dilation, taps and groups into wide-layout weights."""
    del H  # only W matters for the width folding
    d, s = dilation, stride
    Wo = (W - 1) // s + 1
    Wp = W + 2 * d
    eyeW = jnp.eye(W, dtype=jnp.float32)
    eyeWo = jnp.eye(Wo, dtype=jnp.float32)
    eyeC = jnp.eye(cout, dtype=jnp.float32)

    kp = {}
    # conv1 as a width-block-diagonal dense matmul in the wide layout
    kp["w1w"] = jnp.kron(eyeW, p["w1"])                          # (W*cin, W*cout)
    kp["s1w"] = jnp.tile(p["s1"], W).reshape(1, -1)
    kp["b1w"] = jnp.tile(p["b1"], W).reshape(1, -1)

    # conv2: fold kw taps + column stride + groups into 3 matrices (one per kh)
    w2f = jnp.zeros((3, Wp * cout, Wo * cout), jnp.float32)
    for kh in range(3):
        for kw in range(3):
            blk = p["w2_dense"][kh, kw]                          # (cout, cout)
            for ow in range(Wo):
                r0 = (s * ow + kw * d) * cout
                c0 = ow * cout
                w2f = w2f.at[kh, r0:r0 + cout, c0:c0 + cout].set(blk)
    kp["w2f"] = w2f
    kp["s2w"] = jnp.tile(p["s2"], Wo).reshape(1, -1)
    kp["b2w"] = jnp.tile(p["b2"], Wo).reshape(1, -1)

    # SE helpers: wide <-> per-channel pooling / broadcast matrices
    kp["pool"] = jnp.tile(eyeC, (Wo, 1))                         # (Wo*cout, cout)
    kp["bcast"] = jnp.tile(eyeC, (1, Wo))                        # (cout, Wo*cout)
    kp["w_se1"] = p["w_se1"]
    kp["b_se1"] = p["b_se1"].reshape(1, -1)
    kp["w_se2"] = p["w_se2"]
    kp["b_se2"] = p["b_se2"].reshape(1, -1)

    # conv3 in the wide layout
    kp["w3w"] = jnp.kron(eyeWo, p["w3"])                         # (Wo*cout, Wo*cout)
    kp["s3w"] = jnp.tile(p["s3"], Wo).reshape(1, -1)
    kp["b3w"] = jnp.tile(p["b3"], Wo).reshape(1, -1)

    # shortcut: 1x1 stride-s conv + bn folded into (W*cin, Wo*cout);
    # identity weights/scale when the PyTorch block uses an identity shortcut.
    if s != 1 or cin != cout:
        wsc, ssc, bsc = p["w_sc"], p["s_sc"], p["b_sc"]
    else:
        wsc = jnp.eye(cin, dtype=jnp.float32)
        ssc = jnp.ones((cout,), jnp.float32)
        bsc = jnp.zeros((cout,), jnp.float32)
    wscf = jnp.zeros((W * cin, Wo * cout), jnp.float32)
    for ow in range(Wo):
        wscf = wscf.at[s * ow * cin:(s * ow + 1) * cin,
                       ow * cout:(ow + 1) * cout].set(wsc)
    kp["wscf"] = wscf
    kp["sscw"] = jnp.tile(ssc, Wo).reshape(1, -1)
    kp["bscw"] = jnp.tile(bsc, Wo).reshape(1, -1)
    return kp


# --------------------------- base parameters & reference ----------------------

def _bn_fold(key, c):
    k1, k2, k3, k4 = jax.random.split(key, 4)
    gamma = 1.0 + 0.1 * jax.random.normal(k1, (c,), jnp.float32)
    beta = 0.1 * jax.random.normal(k2, (c,), jnp.float32)
    mean = 0.1 * jax.random.normal(k3, (c,), jnp.float32)
    var = 1.0 + 0.1 * jax.random.uniform(k4, (c,), jnp.float32)
    scale = gamma / jnp.sqrt(var + 1e-5)
    bias = beta - mean * scale
    return scale, bias


def make_params(key, cin, cout, groups):
    cg = cout // groups          # per-group in/out channels of conv2
    wse = cin // 4
    ks = jax.random.split(key, 12)
    p = {}
    p["w1"] = 0.1 * jax.random.normal(ks[0], (cin, cout), jnp.float32)
    p["s1"], p["b1"] = _bn_fold(ks[1], cout)

    w2_g = 0.1 * jax.random.normal(ks[2], (groups, 3, 3, cg, cg), jnp.float32)
    w2_dense = jnp.zeros((3, 3, cout, cout), jnp.float32)
    for g in range(groups):
        w2_dense = w2_dense.at[:, :, g * cg:(g + 1) * cg, g * cg:(g + 1) * cg].set(w2_g[g])
    p["w2_dense"] = w2_dense                                            # kernel
    p["w2_hwio"] = jnp.transpose(w2_g, (1, 2, 3, 0, 4)).reshape(3, 3, cg, cout)  # ref
    p["s2"], p["b2"] = _bn_fold(ks[3], cout)

    p["w3"] = 0.1 * jax.random.normal(ks[4], (cout, cout), jnp.float32)
    p["s3"], p["b3"] = _bn_fold(ks[5], cout)

    p["w_se1"] = 0.1 * jax.random.normal(ks[6], (cout, wse), jnp.float32)
    p["b_se1"] = 0.1 * jax.random.normal(ks[7], (wse,), jnp.float32)
    p["w_se2"] = 0.1 * jax.random.normal(ks[8], (wse, cout), jnp.float32)
    p["b_se2"] = 0.1 * jax.random.normal(ks[9], (cout,), jnp.float32)

    p["w_sc"] = 0.1 * jax.random.normal(ks[10], (cin, cout), jnp.float32)
    p["s_sc"], p["b_sc"] = _bn_fold(ks[11], cout)
    return p


def yblock_ref(x_nchw, p, *, dilation, stride):
    """Pure-JAX reference (same math, plain XLA ops)."""
    x = jnp.transpose(x_nchw, (0, 2, 3, 1))
    cin = x.shape[-1]
    cout = p["w1"].shape[1]
    groups = cout // p["w2_hwio"].shape[2]

    if stride != 1 or cin != cout:
        xs = x[:, ::stride, ::stride, :]
        sc = jnp.einsum("nhwc,co->nhwo", xs, p["w_sc"]) * p["s_sc"] + p["b_sc"]
    else:
        sc = x

    y = jnp.einsum("nhwc,co->nhwo", x, p["w1"]) * p["s1"] + p["b1"]
    y = jnp.maximum(y, 0.0)
    y = lax.conv_general_dilated(
        y, p["w2_hwio"], window_strides=(stride, stride),
        padding=[(dilation, dilation), (dilation, dilation)],
        rhs_dilation=(dilation, dilation),
        dimension_numbers=("NHWC", "HWIO", "NHWC"),
        feature_group_count=groups)
    y = jnp.maximum(y * p["s2"] + p["b2"], 0.0)

    m = jnp.mean(y, axis=(1, 2))                                   # (N, C)
    h = jnp.maximum(m @ p["w_se1"] + p["b_se1"], 0.0)
    g = jax.nn.sigmoid(h @ p["w_se2"] + p["b_se2"])
    y = y * g[:, None, None, :]

    y = jnp.einsum("nhwc,co->nhwo", y, p["w3"]) * p["s3"] + p["b3"]
    out = jnp.maximum(y + sc, 0.0)
    return jnp.transpose(out, (0, 3, 1, 2))


# --------------------------------- main ---------------------------------------

if __name__ == "__main__":
    # YBlock(in_channels=8, out_channels=16, dilation=1, group_width=8, stride=2)
    N, Cin, H, W = 2, 8, 16, 16
    Cout, dilation, group_width, stride = 16, 1, 8, 2
    groups = Cout // group_width

    key = jax.random.PRNGKey(0)
    kx, kparams = jax.random.split(key)
    x = jax.random.normal(kx, (N, Cin, H, W), jnp.float32)      # NCHW, like PyTorch
    base = make_params(kparams, Cin, Cout, groups)
    kp = prepare_params(base, H=H, W=W, cin=Cin, cout=Cout,
                        dilation=dilation, stride=stride)

    fwd = jax.jit(functools.partial(yblock_forward, dilation=dilation, stride=stride))
    out = jax.block_until_ready(fwd(x, kp))

    ref = jax.block_until_ready(yblock_ref(x, base, dilation=dilation, stride=stride))
    Ho, Wo = (H - 1) // stride + 1, (W - 1) // stride + 1
    assert out.shape == (N, Cout, Ho, Wo), out.shape
    assert ref.shape == out.shape
    if not bool(jnp.allclose(out, ref, atol=1e-2, rtol=1e-2)):
        raise AssertionError(
            f"mismatch vs reference: max abs diff = {float(jnp.max(jnp.abs(out - ref)))}")
    print("KERNEL_OK")
</pallas_src>

<mosaic_0001>
module attributes {stable_mosaic.version = 11 : i64} {
  func.func @_yblock_kernel(%arg0: i32, %arg1: memref<1x16x128xf32, #tpu.memory_space<vmem>>, %arg2: memref<128x256xf32, #tpu.memory_space<vmem>>, %arg3: memref<1x256xf32, #tpu.memory_space<vmem>>, %arg4: memref<1x256xf32, #tpu.memory_space<vmem>>, %arg5: memref<3x288x128xf32, #tpu.memory_space<vmem>>, %arg6: memref<1x128xf32, #tpu.memory_space<vmem>>, %arg7: memref<1x128xf32, #tpu.memory_space<vmem>>, %arg8: memref<128x16xf32, #tpu.memory_space<vmem>>, %arg9: memref<16x2xf32, #tpu.memory_space<vmem>>, %arg10: memref<1x2xf32, #tpu.memory_space<vmem>>, %arg11: memref<2x16xf32, #tpu.memory_space<vmem>>, %arg12: memref<1x16xf32, #tpu.memory_space<vmem>>, %arg13: memref<16x128xf32, #tpu.memory_space<vmem>>, %arg14: memref<128x128xf32, #tpu.memory_space<vmem>>, %arg15: memref<1x128xf32, #tpu.memory_space<vmem>>, %arg16: memref<1x128xf32, #tpu.memory_space<vmem>>, %arg17: memref<128x128xf32, #tpu.memory_space<vmem>>, %arg18: memref<1x128xf32, #tpu.memory_space<vmem>>, %arg19: memref<1x128xf32, #tpu.memory_space<vmem>>, %arg20: memref<1x8x128xf32, #tpu.memory_space<vmem>>, %arg21: memref<18x288xf32, #tpu.memory_space<vmem>>) attributes {dimension_semantics = [#tpu.dimension_semantics<parallel>], iteration_bounds = array<i64: 2>, scalar_prefetch = 0 : i64, scratch_operands = 1 : i64, tpu.core_type = #tpu.core_type<tc>, window_params = [{transform_indices = @transform_0, window_bounds = array<i64: 1, 16, 128>}, {pipeline_mode = #tpu.pipeline_mode<synchronous>, transform_indices = @transform_1, window_bounds = array<i64: 128, 256>}, {pipeline_mode = #tpu.pipeline_mode<synchronous>, transform_indices = @transform_2, window_bounds = array<i64: 1, 256>}, {pipeline_mode = #tpu.pipeline_mode<synchronous>, transform_indices = @transform_3, window_bounds = array<i64: 1, 256>}, {pipeline_mode = #tpu.pipeline_mode<synchronous>, transform_indices = @transform_4, window_bounds = array<i64: 3, 288, 128>}, {pipeline_mode = #tpu.pipeline_mode<synchronous>, transform_indices = @transform_5, window_bounds = array<i64: 1, 128>}, {pipeline_mode = #tpu.pipeline_mode<synchronous>, transform_indices = @transform_6, window_bounds = array<i64: 1, 128>}, {pipeline_mode = #tpu.pipeline_mode<synchronous>, transform_indices = @transform_7, window_bounds = array<i64: 128, 16>}, {pipeline_mode = #tpu.pipeline_mode<synchronous>, transform_indices = @transform_8, window_bounds = array<i64: 16, 2>}, {pipeline_mode = #tpu.pipeline_mode<synchronous>, transform_indices = @transform_9, window_bounds = array<i64: 1, 2>}, {pipeline_mode = #tpu.pipeline_mode<synchronous>, transform_indices = @transform_10, window_bounds = array<i64: 2, 16>}, {pipeline_mode = #tpu.pipeline_mode<synchronous>, transform_indices = @transform_11, window_bounds = array<i64: 1, 16>}, {pipeline_mode = #tpu.pipeline_mode<synchronous>, transform_indices = @transform_12, window_bounds = array<i64: 16, 128>}, {pipeline_mode = #tpu.pipeline_mode<synchronous>, transform_indices = @transform_13, window_bounds = array<i64: 128, 128>}, {pipeline_mode = #tpu.pipeline_mode<synchronous>, transform_indices = @transform_14, window_bounds = array<i64: 1, 128>}, {pipeline_mode = #tpu.pipeline_mode<synchronous>, transform_indices = @transform_15, window_bounds = array<i64: 1, 128>}, {pipeline_mode = #tpu.pipeline_mode<synchronous>, transform_indices = @transform_16, window_bounds = array<i64: 128, 128>}, {pipeline_mode = #tpu.pipeline_mode<synchronous>, transform_indices = @transform_17, window_bounds = array<i64: 1, 128>}, {pipeline_mode = #tpu.pipeline_mode<synchronous>, transform_indices = @transform_18, window_bounds = array<i64: 1, 128>}, {transform_indices = @transform_19, window_bounds = array<i64: 1, 8, 128>}]} {
    %c0 = arith.constant 0 : index
    %c0_0 = arith.constant 0 : index
    %c0_1 = arith.constant 0 : index
    %0 = vector.load %arg1[%c0, %c0_0, %c0_1] : memref<1x16x128xf32, #tpu.memory_space<vmem>>, vector<1x16x128xf32>
    %1 = vector.shape_cast %0 : vector<1x16x128xf32> to vector<16x128xf32>
    %c0_2 = arith.constant 0 : index
    %c0_3 = arith.constant 0 : index
    %2 = vector.load %arg2[%c0_2, %c0_3] : memref<128x256xf32, #tpu.memory_space<vmem>>, vector<128x256xf32>
    %cst = arith.constant dense<0.000000e+00> : vector<16x256xf32>
    %3 = tpu.matmul %1, %2, %cst {dimension_numbers = #tpu.dot_dimension_numbers<[1], [0], [0], [1], [0, 0, 1, 1], [], []>} : vector<16x128xf32>, vector<128x256xf32>, vector<16x256xf32> -> vector<16x256xf32>
    %c0_4 = arith.constant 0 : index
    %c0_5 = arith.constant 0 : index
    %4 = vector.load %arg3[%c0_4, %c0_5] : memref<1x256xf32, #tpu.memory_space<vmem>>, vector<1x256xf32>
    %5 = vector.broadcast %4 : vector<1x256xf32> to vector<16x256xf32>
    %6 = arith.mulf %3, %5 : vector<16x256xf32>
    %c0_6 = arith.constant 0 : index
    %c0_7 = arith.constant 0 : index
    %7 = vector.load %arg4[%c0_6, %c0_7] : memref<1x256xf32, #tpu.memory_space<vmem>>, vector<1x256xf32>
    %8 = vector.broadcast %7 : vector<1x256xf32> to vector<16x256xf32>
    %9 = arith.addf %6, %8 : vector<16x256xf32>
    %cst_8 = arith.constant 0.000000e+00 : f32
    %10 = vector.broadcast %cst_8 : f32 to vector<16x256xf32>
    %11 = arith.maximumf %9, %10 : vector<16x256xf32>
    %cst_9 = arith.constant 0.000000e+00 : f32
    %12 = vector.broadcast %cst_9 : f32 to vector<18x288xf32>
    %c0_10 = arith.constant 0 : index
    %c0_11 = arith.constant 0 : index
    %13 = vector.load %arg21[%c0_10, %c0_11] : memref<18x288xf32, #tpu.memory_space<vmem>>, vector<18x288xf32>
    tpu.vector_store %arg21[%c0_10, %c0_11], %12 {strides = array<i32>} : memref<18x288xf32, #tpu.memory_space<vmem>>, vector<18x288xf32>,
    %14 = vector.extract_strided_slice %11 {offsets = [0, 0], sizes = [8, 256], strides = [1, 1]} : vector<16x256xf32> to vector<8x256xf32>
    %c1 = arith.constant 1 : index
    %c16 = arith.constant 16 : index
    %15 = vector.load %arg21[%c1, %c16] : memref<18x288xf32, #tpu.memory_space<vmem>>, vector<8x256xf32>
    tpu.vector_store %arg21[%c1, %c16], %14 {strides = array<i32>} : memref<18x288xf32, #tpu.memory_space<vmem>>, vector<8x256xf32>,
    %16 = vector.extract_strided_slice %11 {offsets = [8, 0], sizes = [8, 256], strides = [1, 1]} : vector<16x256xf32> to vector<8x256xf32>
    %c9 = arith.constant 9 : index
    %c16_12 = arith.constant 16 : index
    %17 = vector.load %arg21[%c9, %c16_12] : memref<18x288xf32, #tpu.memory_space<vmem>>, vector<8x256xf32>
    tpu.vector_store %arg21[%c9, %c16_12], %16 {strides = array<i32>} : memref<18x288xf32, #tpu.memory_space<vmem>>, vector<8x256xf32>,
    %cst_13 = arith.constant 0.000000e+00 : f32
    %18 = vector.broadcast %cst_13 : f32 to vector<8x128xf32>
    %c0_14 = arith.constant 0 : index
    %c0_15 = arith.constant 0 : index
    %19 = vector.load %arg21[%c0_14, %c0_15] : memref<18x288xf32, #tpu.memory_space<vmem>>, vector<8x288xf32>
    %c0_16 = arith.constant 0 : index
    %c0_17 = arith.constant 0 : index
    %c0_18 = arith.constant 0 : index
    %20 = vector.load %arg5[%c0_16, %c0_17, %c0_18] : memref<3x288x128xf32, #tpu.memory_space<vmem>>, vector<1x288x128xf32>
    %21 = vector.shape_cast %20 : vector<1x288x128xf32> to vector<288x128xf32>
    %cst_19 = arith.constant dense<0.000000e+00> : vector<8x128xf32>
    %22 = tpu.matmul %19, %21, %cst_19 {dimension_numbers = #tpu.dot_dimension_numbers<[1], [0], [0], [1], [0, 0, 1, 1], [], []>} : vector<8x288xf32>, vector<288x128xf32>, vector<8x128xf32> -> vector<8x128xf32>
    %23 = arith.addf %18, %22 : vector<8x128xf32>
    %c9_20 = arith.constant 9 : index
    %c0_21 = arith.constant 0 : index
    %24 = vector.load %arg21[%c9_20, %c0_21] : memref<18x288xf32, #tpu.memory_space<vmem>>, vector<8x288xf32>
    %c1_22 = arith.constant 1 : index
    %c0_23 = arith.constant 0 : index
    %c0_24 = arith.constant 0 : index
    %25 = vector.load %arg5[%c1_22, %c0_23, %c0_24] : memref<3x288x128xf32, #tpu.memory_space<vmem>>, vector<1x288x128xf32>
    %26 = vector.shape_cast %25 : vector<1x288x128xf32> to vector<288x128xf32>
    %cst_25 = arith.constant dense<0.000000e+00> : vector<8x128xf32>
    %27 = tpu.matmul %24, %26, %cst_25 {dimension_numbers = #tpu.dot_dimension_numbers<[1], [0], [0], [1], [0, 0, 1, 1], [], []>} : vector<8x288xf32>, vector<288x128xf32>, vector<8x128xf32> -> vector<8x128xf32>
    %28 = arith.addf %23, %27 : vector<8x128xf32>
    %c1_26 = arith.constant 1 : index
    %c0_27 = arith.constant 0 : index
    %29 = vector.load %arg21[%c1_26, %c0_27] : memref<18x288xf32, #tpu.memory_space<vmem>>, vector<8x288xf32>
    %c2 = arith.constant 2 : index
    %c0_28 = arith.constant 0 : index
    %c0_29 = arith.constant 0 : index
    %30 = vector.load %arg5[%c2, %c0_28, %c0_29] : memref<3x288x128xf32, #tpu.memory_space<vmem>>, vector<1x288x128xf32>
    %31 = vector.shape_cast %30 : vector<1x288x128xf32> to vector<288x128xf32>
    %cst_30 = arith.constant dense<0.000000e+00> : vector<8x128xf32>
    %32 = tpu.matmul %29, %31, %cst_30 {dimension_numbers = #tpu.dot_dimension_numbers<[1], [0], [0], [1], [0, 0, 1, 1], [], []>} : vector<8x288xf32>, vector<288x128xf32>, vector<8x128xf32> -> vector<8x128xf32>
    %33 = arith.addf %28, %32 : vector<8x128xf32>
    %c0_31 = arith.constant 0 : index
    %c0_32 = arith.constant 0 : index
    %34 = vector.load %arg6[%c0_31, %c0_32] : memref<1x128xf32, #tpu.memory_space<vmem>>, vector<1x128xf32>
    %35 = vector.broadcast %34 : vector<1x128xf32> to vector<8x128xf32>
    %36 = arith.mulf %33, %35 : vector<8x128xf32>
    %c0_33 = arith.constant 0 : index
    %c0_34 = arith.constant 0 : index
    %37 = vector.load %arg7[%c0_33, %c0_34] : memref<1x128xf32, #tpu.memory_space<vmem>>, vector<1x128xf32>
    %38 = vector.broadcast %37 : vector<1x128xf32> to vector<8x128xf32>
    %39 = arith.addf %36, %38 : vector<8x128xf32>
    %cst_35 = arith.constant 0.000000e+00 : f32
    %40 = vector.broadcast %cst_35 : f32 to vector<8x128xf32>
    %41 = arith.maximumf %39, %40 : vector<8x128xf32>
    %cst_36 = arith.constant dense<0.000000e+00> : vector<128xf32>
    %42 = vector.multi_reduction <add>, %41, %cst_36 [0] : vector<8x128xf32> to vector<128xf32>
    %43 = vector.shape_cast %42 : vector<128xf32> to vector<1x128xf32>
    %c0_37 = arith.constant 0 : index
    %c0_38 = arith.constant 0 : index
    %44 = vector.load %arg8[%c0_37, %c0_38] : memref<128x16xf32, #tpu.memory_space<vmem>>, vector<128x16xf32>
    %cst_39 = arith.constant dense<0.000000e+00> : vector<1x16xf32>
    %45 = tpu.matmul %43, %44, %cst_39 {dimension_numbers = #tpu.dot_dimension_numbers<[1], [0], [0], [1], [0, 0, 1, 1], [], []>} : vector<1x128xf32>, vector<128x16xf32>, vector<1x16xf32> -> vector<1x16xf32>
    %cst_40 = arith.constant 1.562500e-02 : f32
    %46 = vector.broadcast %cst_40 : f32 to vector<1x16xf32>
    %47 = arith.mulf %45, %46 : vector<1x16xf32>
    %c0_41 = arith.constant 0 : index
    %c0_42 = arith.constant 0 : index
    %48 = vector.load %arg9[%c0_41, %c0_42] : memref<16x2xf32, #tpu.memory_space<vmem>>, vector<16x2xf32>
    %cst_43 = arith.constant dense<0.000000e+00> : vector<1x2xf32>
    %49 = tpu.matmul %47, %48, %cst_43 {dimension_numbers = #tpu.dot_dimension_numbers<[1], [0], [0], [1], [0, 0, 1, 1], [], []>} : vector<1x16xf32>, vector<16x2xf32>, vector<1x2xf32> -> vector<1x2xf32>
    %c0_44 = arith.constant 0 : index
    %c0_45 = arith.constant 0 : index
    %50 = vector.load %arg10[%c0_44, %c0_45] : memref<1x2xf32, #tpu.memory_space<vmem>>, vector<1x2xf32>
    %51 = arith.addf %49, %50 : vector<1x2xf32>
    %cst_46 = arith.constant 0.000000e+00 : f32
    %52 = vector.broadcast %cst_46 : f32 to vector<1x2xf32>
    %53 = arith.maximumf %51, %52 : vector<1x2xf32>
    %c0_47 = arith.constant 0 : index
    %c0_48 = arith.constant 0 : index
    %54 = vector.load %arg11[%c0_47, %c0_48] : memref<2x16xf32, #tpu.memory_space<vmem>>, vector<2x16xf32>
    %cst_49 = arith.constant dense<0.000000e+00> : vector<1x16xf32>
    %55 = tpu.matmul %53, %54, %cst_49 {dimension_numbers = #tpu.dot_dimension_numbers<[1], [0], [0], [1], [0, 0, 1, 1], [], []>} : vector<1x2xf32>, vector<2x16xf32>, vector<1x16xf32> -> vector<1x16xf32>
    %c0_50 = arith.constant 0 : index
    %c0_51 = arith.constant 0 : index
    %56 = vector.load %arg12[%c0_50, %c0_51] : memref<1x16xf32, #tpu.memory_space<vmem>>, vector<1x16xf32>
    %57 = arith.addf %55, %56 : vector<1x16xf32>
    %58 = arith.negf %57 : vector<1x16xf32>
    %59 = math.exp %58 : vector<1x16xf32>
    %cst_52 = arith.constant 1.000000e+00 : f32
    %60 = vector.broadcast %cst_52 : f32 to vector<1x16xf32>
    %61 = arith.addf %60, %59 : vector<1x16xf32>
    %62 = arith.divf %60, %61 : vector<1x16xf32>
    %c0_53 = arith.constant 0 : index
    %c0_54 = arith.constant 0 : index
    %63 = vector.load %arg13[%c0_53, %c0_54] : memref<16x128xf32, #tpu.memory_space<vmem>>, vector<16x128xf32>
    %cst_55 = arith.constant dense<0.000000e+00> : vector<1x128xf32>
    %64 = tpu.matmul %62, %63, %cst_55 {dimension_numbers = #tpu.dot_dimension_numbers<[1], [0], [0], [1], [0, 0, 1, 1], [], []>} : vector<1x16xf32>, vector<16x128xf32>, vector<1x128xf32> -> vector<1x128xf32>
    %65 = vector.broadcast %64 : vector<1x128xf32> to vector<8x128xf32>
    %66 = arith.mulf %41, %65 : vector<8x128xf32>
    %c0_56 = arith.constant 0 : index
    %c0_57 = arith.constant 0 : index
    %67 = vector.load %arg14[%c0_56, %c0_57] : memref<128x128xf32, #tpu.memory_space<vmem>>, vector<128x128xf32>
    %cst_58 = arith.constant dense<0.000000e+00> : vector<8x128xf32>
    %68 = tpu.matmul %66, %67, %cst_58 {dimension_numbers = #tpu.dot_dimension_numbers<[1], [0], [0], [1], [0, 0, 1, 1], [], []>} : vector<8x128xf32>, vector<128x128xf32>, vector<8x128xf32> -> vector<8x128xf32>
    %c0_59 = arith.constant 0 : index
    %c0_60 = arith.constant 0 : index
    %69 = vector.load %arg15[%c0_59, %c0_60] : memref<1x128xf32, #tpu.memory_space<vmem>>, vector<1x128xf32>
    %70 = vector.broadcast %69 : vector<1x128xf32> to vector<8x128xf32>
    %71 = arith.mulf %68, %70 : vector<8x128xf32>
    %c0_61 = arith.constant 0 : index
    %c0_62 = arith.constant 0 : index
    %72 = vector.load %arg16[%c0_61, %c0_62] : memref<1x128xf32, #tpu.memory_space<vmem>>, vector<1x128xf32>
    %73 = vector.broadcast %72 : vector<1x128xf32> to vector<8x128xf32>
    %74 = arith.addf %71, %73 : vector<8x128xf32>
    %c0_63 = arith.constant 0 : index
    %c8 = arith.constant 8 : index
    %c0_64 = arith.constant 0 : index
    %75 = vector.load %arg1[%c0_63, %c8, %c0_64] : memref<1x16x128xf32, #tpu.memory_space<vmem>>, vector<1x8x128xf32>
    %76 = vector.shape_cast %75 : vector<1x8x128xf32> to vector<8x128xf32>
    %c0_65 = arith.constant 0 : index
    %c0_66 = arith.constant 0 : index
    %77 = vector.load %arg17[%c0_65, %c0_66] : memref<128x128xf32, #tpu.memory_space<vmem>>, vector<128x128xf32>
    %cst_67 = arith.constant dense<0.000000e+00> : vector<8x128xf32>
    %78 = tpu.matmul %76, %77, %cst_67 {dimension_numbers = #tpu.dot_dimension_numbers<[1], [0], [0], [1], [0, 0, 1, 1], [], []>} : vector<8x128xf32>, vector<128x128xf32>, vector<8x128xf32> -> vector<8x128xf32>
    %c0_68 = arith.constant 0 : index
    %c0_69 = arith.constant 0 : index
    %79 = vector.load %arg18[%c0_68, %c0_69] : memref<1x128xf32, #tpu.memory_space<vmem>>, vector<1x128xf32>
    %80 = vector.broadcast %79 : vector<1x128xf32> to vector<8x128xf32>
    %81 = arith.mulf %78, %80 : vector<8x128xf32>
    %c0_70 = arith.constant 0 : index
    %c0_71 = arith.constant 0 : index
    %82 = vector.load %arg19[%c0_70, %c0_71] : memref<1x128xf32, #tpu.memory_space<vmem>>, vector<1x128xf32>
    %83 = vector.broadcast %82 : vector<1x128xf32> to vector<8x128xf32>
    %84 = arith.addf %81, %83 : vector<8x128xf32>
    %85 = arith.addf %74, %84 : vector<8x128xf32>
    %cst_72 = arith.constant 0.000000e+00 : f32
    %86 = vector.broadcast %cst_72 : f32 to vector<8x128xf32>
    %87 = arith.maximumf %85, %86 : vector<8x128xf32>
    %c0_73 = arith.constant 0 : index
    %c0_74 = arith.constant 0 : index
    %c0_75 = arith.constant 0 : index
    %88 = vector.load %arg20[%c0_73, %c0_74, %c0_75] : memref<1x8x128xf32, #tpu.memory_space<vmem>>, vector<1x8x128xf32>
    %89 = vector.shape_cast %88 : vector<1x8x128xf32> to vector<8x128xf32>
    %90 = vector.shape_cast %87 : vector<8x128xf32> to vector<1x8x128xf32>
    tpu.vector_store %arg20[%c0_73, %c0_74, %c0_75], %90 {strides = array<i32>} : memref<1x8x128xf32, #tpu.memory_space<vmem>>, vector<1x8x128xf32>,
    return
  }
  func.func @transform_0(%arg0: i32) -> (i32, i32, i32) {
    %c0_i32 = arith.constant 0 : i32
    %c0_i32_0 = arith.constant 0 : i32
    %c0_i32_1 = arith.constant 0 : i32
    return %arg0, %c0_i32, %c0_i32_0 : i32, i32, i32
  }
  func.func @transform_1(%arg0: i32) -> (i32, i32) {
    %c0_i32 = arith.constant 0 : i32
    %c0_i32_0 = arith.constant 0 : i32
    %c0_i32_1 = arith.constant 0 : i32
    return %c0_i32, %c0_i32_0 : i32, i32
  }
  func.func @transform_2(%arg0: i32) -> (i32, i32) {
    %c0_i32 = arith.constant 0 : i32
    %c0_i32_0 = arith.constant 0 : i32
    %c0_i32_1 = arith.constant 0 : i32
    return %c0_i32, %c0_i32_0 : i32, i32
  }
  func.func @transform_3(%arg0: i32) -> (i32, i32) {
    %c0_i32 = arith.constant 0 : i32
    %c0_i32_0 = arith.constant 0 : i32
    %c0_i32_1 = arith.constant 0 : i32
    return %c0_i32, %c0_i32_0 : i32, i32
  }
  func.func @transform_4(%arg0: i32) -> (i32, i32, i32) {
    %c0_i32 = arith.constant 0 : i32
    %c0_i32_0 = arith.constant 0 : i32
    %c0_i32_1 = arith.constant 0 : i32
    %c0_i32_2 = arith.constant 0 : i32
    return %c0_i32, %c0_i32_0, %c0_i32_1 : i32, i32, i32
  }
  func.func @transform_5(%arg0: i32) -> (i32, i32) {
    %c0_i32 = arith.constant 0 : i32
    %c0_i32_0 = arith.constant 0 : i32
    %c0_i32_1 = arith.constant 0 : i32
    return %c0_i32, %c0_i32_0 : i32, i32
  }
  func.func @transform_6(%arg0: i32) -> (i32, i32) {
    %c0_i32 = arith.constant 0 : i32
    %c0_i32_0 = arith.constant 0 : i32
    %c0_i32_1 = arith.constant 0 : i32
    return %c0_i32, %c0_i32_0 : i32, i32
  }
  func.func @transform_7(%arg0: i32) -> (i32, i32) {
    %c0_i32 = arith.constant 0 : i32
    %c0_i32_0 = arith.constant 0 : i32
    %c0_i32_1 = arith.constant 0 : i32
    return %c0_i32, %c0_i32_0 : i32, i32
  }
  func.func @transform_8(%arg0: i32) -> (i32, i32) {
    %c0_i32 = arith.constant 0 : i32
    %c0_i32_0 = arith.constant 0 : i32
    %c0_i32_1 = arith.constant 0 : i32
    return %c0_i32, %c0_i32_0 : i32, i32
  }
  func.func @transform_9(%arg0: i32) -> (i32, i32) {
    %c0_i32 = arith.constant 0 : i32
    %c0_i32_0 = arith.constant 0 : i32
    %c0_i32_1 = arith.constant 0 : i32
    return %c0_i32, %c0_i32_0 : i32, i32
  }
  func.func @transform_10(%arg0: i32) -> (i32, i32) {
    %c0_i32 = arith.constant 0 : i32
    %c0_i32_0 = arith.constant 0 : i32
    %c0_i32_1 = arith.constant 0 : i32
    return %c0_i32, %c0_i32_0 : i32, i32
  }
  func.func @transform_11(%arg0: i32) -> (i32, i32) {
    %c0_i32 = arith.constant 0 : i32
    %c0_i32_0 = arith.constant 0 : i32
    %c0_i32_1 = arith.constant 0 : i32
    return %c0_i32, %c0_i32_0 : i32, i32
  }
  func.func @transform_12(%arg0: i32) -> (i32, i32) {
    %c0_i32 = arith.constant 0 : i32
    %c0_i32_0 = arith.constant 0 : i32
    %c0_i32_1 = arith.constant 0 : i32
    return %c0_i32, %c0_i32_0 : i32, i32
  }
  func.func @transform_13(%arg0: i32) -> (i32, i32) {
    %c0_i32 = arith.constant 0 : i32
    %c0_i32_0 = arith.constant 0 : i32
    %c0_i32_1 = arith.constant 0 : i32
    return %c0_i32, %c0_i32_0 : i32, i32
  }
  func.func @transform_14(%arg0: i32) -> (i32, i32) {
    %c0_i32 = arith.constant 0 : i32
    %c0_i32_0 = arith.constant 0 : i32
    %c0_i32_1 = arith.constant 0 : i32
    return %c0_i32, %c0_i32_0 : i32, i32
  }
  func.func @transform_15(%arg0: i32) -> (i32, i32) {
    %c0_i32 = arith.constant 0 : i32
    %c0_i32_0 = arith.constant 0 : i32
    %c0_i32_1 = arith.constant 0 : i32
    return %c0_i32, %c0_i32_0 : i32, i32
  }
  func.func @transform_16(%arg0: i32) -> (i32, i32) {
    %c0_i32 = arith.constant 0 : i32
    %c0_i32_0 = arith.constant 0 : i32
    %c0_i32_1 = arith.constant 0 : i32
    return %c0_i32, %c0_i32_0 : i32, i32
  }
  func.func @transform_17(%arg0: i32) -> (i32, i32) {
    %c0_i32 = arith.constant 0 : i32
    %c0_i32_0 = arith.constant 0 : i32
    %c0_i32_1 = arith.constant 0 : i32
    return %c0_i32, %c0_i32_0 : i32, i32
  }
  func.func @transform_18(%arg0: i32) -> (i32, i32) {
    %c0_i32 = arith.constant 0 : i32
    %c0_i32_0 = arith.constant 0 : i32
    %c0_i32_1 = arith.constant 0 : i32
    return %c0_i32, %c0_i32_0 : i32, i32
  }
  func.func @transform_19(%arg0: i32) -> (i32, i32, i32) {
    %c0_i32 = arith.constant 0 : i32
    %c0_i32_0 = arith.constant 0 : i32
    %c0_i32_1 = arith.constant 0 : i32
    return %arg0, %c0_i32, %c0_i32_0 : i32, i32, i32
  }
}

</mosaic_0001>

<bundles_post_ra>
// kernel: yblock_forward.1
= control target key start
LH: loop header
LB: loop body
LE: loop exit
PB: predicated region body
PF: predicated region fallthrough
CT: control target
= control target key end

     0   :  { %s3520_s0 = inlined_call_operand.vmem [shape: f32[2,16,128], index: 0, kind: input, shape index: {}]   ;;  %s3521_s1 = inlined_call_operand.vmem [shape: f32[128,256], index: 1, kind: input, shape index: {}]   ;;  %s3522_s2 = inlined_call_operand.vmem [shape: f32[1,256], index: 2, kind: input, shape index: {}]   ;;  %s3523_s3 = inlined_call_operand.vmem [shape: f32[1,256], index: 3, kind: input, shape index: {}]   ;;  %s3524_s4 = inlined_call_operand.vmem [shape: f32[3,288,128], index: 4, kind: input, shape index: {}]   ;;  %s3525_s5 = inlined_call_operand.vmem [shape: f32[1,128], index: 5, kind: input, shape index: {}]   ;;  %s3526_s6 = inlined_call_operand.vmem [shape: f32[1,128], index: 6, kind: input, shape index: {}]   ;;  %s3527_s7 = inlined_call_operand.vmem [shape: f32[128,16], index: 7, kind: input, shape index: {}]   ;;  %s3528_s8 = inlined_call_operand.vmem [shape: f32[16,2], index: 8, kind: input, shape index: {}]   ;;  %s3529_s9 = inlined_call_operand.vmem [shape: f32[1,2], index: 9, kind: input, shape index: {}]   ;;  %s3530_s10 = inlined_call_operand.vmem [shape: f32[2,16], index: 10, kind: input, shape index: {}]   ;;  %s3531_s11 = inlined_call_operand.vmem [shape: f32[1,16], index: 11, kind: input, shape index: {}]   ;;  %s3532_s12 = inlined_call_operand.vmem [shape: f32[16,128], index: 12, kind: input, shape index: {}]   ;;  %s3533_s13 = inlined_call_operand.vmem [shape: f32[128,128], index: 13, kind: input, shape index: {}]   ;;  %s3534_s14 = inlined_call_operand.vmem [shape: f32[1,128], index: 14, kind: input, shape index: {}]   ;;  %s3535_s15 = inlined_call_operand.vmem [shape: f32[1,128], index: 15, kind: input, shape index: {}]   ;;  %s3536_s16 = inlined_call_operand.vmem [shape: f32[128,128], index: 16, kind: input, shape index: {}]   ;;  %s3537_s17 = inlined_call_operand.vmem [shape: f32[1,128], index: 17, kind: input, shape index: {}]   ;;  %s3538_s18 = inlined_call_operand.vmem [shape: f32[1,128], index: 18, kind: input, shape index: {}]   ;;  %s3539_s19 = inlined_call_operand.vmem [shape: f32[2,8,128], index: 19, kind: output, shape index: {}]  }
   0x1   :  { %3541 = sst [smem:[#allocation3_spill]] %s3520_s0  ;;  %s2794_s0 = smov 0  }
   0x2   :  { %3542 = sst [smem:[#allocation4_spill]] %s3521_s1 }
   0x3   :  { %3543 = sst [smem:[#allocation5_spill]] %s3522_s2 }
   0x4   :  { %3544 = sst [smem:[#allocation6_spill]] %s3523_s3 }
   0x5 LB: > { %s2002_s30 = sadd.s32 4294967295, %s2688_s0   ;;  %p2006_p0 = scmp.ge.s32.totalorder %s2688_s0, 1  ;;  %s2688_s0 = sphi %s2794_s0, %s29_s0  }
   0x6   : > { %p537_p1 = scmp.lt.s32.totalorder %s2688_s0, 3 }
   0x8   : > { %p538_p2 = pnand %p2006_p0, %p537_p1 }
   0x9   : > { %s3545_s1 = sld [smem:[#allocation4_spill]] (!%p538_p2)  ;;  %v2690_v7 = vmov (!%p538_p2), 0.0   ;;  %p592_p3 = scmp.lt.s32.totalorder (!%p538_p2), %s2002_s30, 1  ;;  %v2026_v51 = vld [vmem:[%s3524_s4 + $0x1a0] sm:$0xff] (!%p538_p2)  ;;  %v2027_v52 = vld [vmem:[%s3524_s4 + $0x1a8] sm:$0xff] (!%p538_p2)  ;;  %vm750_vm0 = vcmask (!%p538_p2), 261120  }
   0xa   : > { %541 = sbr.rel (%p538_p2) target bundleno = 1791 (0x6ff), region = 96  ;;  %699 = vmatprep.mubr.f32.mxu0 (!%p538_p2), %v2690_v7  ;;  %748 = vst [vmem:[#allocation2] sm:$0xff] (!%p538_p2), %v2690_v7  ;;  %749 = vst [vmem:[#allocation2 + $0x8] sm:$0xff] (!%p538_p2), %v2690_v7  ;;  %s3546_s3 = sld [smem:[#allocation3_spill]] (!%p538_p2)  ;;  %v2010_v53 = vld [vmem:[%s3524_s4 + $0x120] sm:$0xff] (!%p538_p2)  ;;  %v2467_v54 = vpack.c.bf16 (!%p538_p2), %v2027_v52, %v2026_v51  ;;  %v2011_v55 = vld [vmem:[%s3524_s4 + $0x128] sm:$0xff] (!%p538_p2) }
   0xb   : > { %752 = vst [vmem:[#allocation2 + $0x18] sm:$0xff] (!%p538_p2), %v2690_v7  ;;  %753 = vst [vmem:[#allocation2 + $0x20] sm:$0xff] (!%p538_p2), %v2690_v7  ;;  %v2028_v56 = vld [vmem:[%s3524_s4 + $0x1b0] sm:$0xff] (!%p538_p2)  ;;  %v2029_v57 = vld [vmem:[%s3524_s4 + $0x1b8] sm:$0xff] (!%p538_p2)  ;;  %v2469_v58 = vpack.c.bf16 (!%p538_p2), %v2011_v55, %v2010_v53  ;;  %s3547_s21 = sld [smem:[#allocation5_spill]] (!%p538_p2)  ;;  %vm757_vm1 = vcmask (!%p538_p2), 254976  }
   0xc   : > { %755 = vst [vmem:[#allocation2 + $0x30] sm:$0x3] (!%p538_p2), %v2690_v7  ;;  %756 = vst [vmem:[#allocation2 + $0x38] sm:$0x3] (!%p538_p2), %v2690_v7  ;;  %v2471_v59 = vpack.c.bf16 (!%p538_p2), %v2029_v57, %v2028_v56  ;;  %v2012_v60 = vld [vmem:[%s3524_s4 + $0x130] sm:$0xff] (!%p538_p2)  ;;  %v2013_v61 = vld [vmem:[%s3524_s4 + $0x138] sm:$0xff] (!%p538_p2)  ;;  %2468 = vmatprep.subr.bf16.mxu1 (!%p538_p2), %v2467_v54 }
   0xd   : > { %751 = vst.msk [vmem:[#allocation2 + $0x10] sm:$0xff] (!%p538_p2), %vm750_vm0, %v2690_v7  ;;  %754 = vst.msk [vmem:[#allocation2 + $0x28] sm:$0xff] (!%p538_p2), %vm750_vm0, %v2690_v7  ;;  %v2030_v62 = vld [vmem:[%s3524_s4 + $0x1c0] sm:$0xff] (!%p538_p2)  ;;  %v2031_v63 = vld [vmem:[%s3524_s4 + $0x1c8] sm:$0xff] (!%p538_p2)  ;;  %2470 = vmatpush3.bf16.msra.mxu1 (!%p538_p2), %v2469_v58  ;;  %vm2692_vm2 = vmmov (!%p538_p2), 0   ;;  %vm775_vm3 = vcmask (!%p538_p2), 130049  }
   0xe   : > { %2472 = vmatprep.subr.bf16.mxu1 (!%p538_p2), %v2471_v59  ;;  %758 = vst.msk [vmem:[#allocation2 + $0x40] sm:$0x3] (!%p538_p2), %vm757_vm1, %v2690_v7  ;;  %v2038_v52 = vld [vmem:[%s3524_s4 + $0x200] sm:$0xff] (!%p538_p2)  ;;  %v2039_v53 = vld [vmem:[%s3524_s4 + $0x208] sm:$0xff] (!%p538_p2)  ;;  %vm780_vm4 = vcmask (!%p538_p2), 122880   ;;  %vm767_vm5 = vcmask (!%p538_p2), 130048  }
   0xf   : > { %v604_v0 = vld [vmem:[%s3545_s1 + $0x8] sm:$0xff] (!%p538_p2)  ;;  %v606_v1 = vld [vmem:[%s3545_s1 + $0x18] sm:$0xff] (!%p538_p2)  ;;  %v603_v2 = vld [vmem:[%s3545_s1] sm:$0xff] (!%p538_p2)  ;;  %v2491_v56 = vpack.c.bf16 (!%p538_p2), %v2039_v53, %v2038_v52  ;;  %vm772_vm6 = vcmask (!%p538_p2), 1047681   ;;  %vm777_vm7 = vcmask (!%p538_p2), 1040512   ;;  %vm888_vm8 = vcmask (!%p538_p2), 1046528  }
  0x10   : > { %v2435_v3 = vpack.c.bf16 (!%p538_p2), %v606_v1, %v604_v0  ;;  %v605_v4 = vld [vmem:[%s3545_s1 + $0x10] sm:$0xff] (!%p538_p2)  ;;  %v608_v5 = vld [vmem:[%s3545_s1 + $0x28] sm:$0xff] (!%p538_p2)  ;;  %v610_v6 = vld [vmem:[%s3545_s1 + $0x38] sm:$0xff] (!%p538_p2)  ;;  %v2473_v0 = vpack.c.bf16 (!%p538_p2), %v2013_v61, %v2012_v60  ;;  %v2475_v1 = vpack.c.bf16 (!%p538_p2), %v2031_v63, %v2030_v62  ;;  %vm1581_vm9 = vcmask (!%p538_p2), 1041408  }
  0x11   : > { %v2437_v8 = vpack.c.bf16 %v605_v4, %v603_v2  ;;  %v2439_v9 = vpack.c.bf16 %v610_v6, %v608_v5  ;;  %v607_v10 = vld [vmem:[%s3545_s1 + $0x20] sm:$0xff]  ;;  %v609_v11 = vld [vmem:[%s3545_s1 + $0x30] sm:$0xff]  ;;  %v612_v12 = vld [vmem:[%s3545_s1 + $0x48] sm:$0xff]  ;;  %s3550_s30 = smov (!%p592_p3, %s2002_s30), 1  ;;  %v714_v5 = vlaneseq  ;;  %vm1577_vm10 = vcmask 15360  }
  0x12   : > { %2436 = vmatprep.subr.bf16.mxu0 %v2435_v3  ;;  %v614_v13 = vld [vmem:[%s3545_s1 + $0x58] sm:$0xff]  ;;  %v2441_v14 = vpack.c.bf16 %v609_v11, %v607_v10  ;;  %v611_v16 = vld [vmem:[%s3545_s1 + $0x40] sm:$0xff]  ;;  %v613_v17 = vld [vmem:[%s3545_s1 + $0x50] sm:$0xff]  ;;  %s2098_s23 = sshll.u32 %s3550_s30, 4  ;;  %2474 = vmatpush3.bf16.msra.mxu1 %v2473_v0  ;;  %s2009_s20 = sshll.u32 %s3550_s30, 3 }
  0x13   : > { %2438 = vmatpush1.bf16.msra.mxu0 %v2437_v8  ;;  %v2443_v15 = vpack.c.bf16 %v614_v13, %v612_v12  ;;  %v616_v18 = vld [vmem:[%s3545_s1 + $0x68] sm:$0xff]  ;;  %v618_v19 = vld [vmem:[%s3545_s1 + $0x78] sm:$0xff]  ;;  %v2445_v20 = vpack.c.bf16 %v613_v17, %v611_v16  ;;  %v615_v22 = vld [vmem:[%s3545_s1 + $0x60] sm:$0xff]  ;;  %s2915_s26 = scalar_lea.vmem %s3546_s3, %s2098_s23  ;;  %2476 = vmatprep.subr.bf16.mxu1 %v2475_v1  ;;  %v715_v6 = vshrl.u32 %v714_v5, 7 }
  0x14   : > { %2440 = vmatprep.subr.bf16.mxu0 %v2439_v9  ;;  %v2447_v21 = vpack.c.bf16 %v618_v19, %v616_v18  ;;  %v617_v23 = vld [vmem:[%s3545_s1 + $0x70] sm:$0xff]  ;;  %v620_v24 = vld [vmem:[%s3545_s1 + $0x88] sm:$0xff]  ;;  %v622_v25 = vld [vmem:[%s3545_s1 + $0x98] sm:$0xff] }
  0x15   : > { %v2449_v26 = vpack.c.bf16 %v617_v23, %v615_v22  ;;  %v2451_v27 = vpack.c.bf16 %v622_v25, %v620_v24  ;;  %v619_v28 = vld [vmem:[%s3545_s1 + $0x80] sm:$0xff]  ;;  %v621_v29 = vld [vmem:[%s3545_s1 + $0x90] sm:$0xff]  ;;  %v624_v30 = vld [vmem:[%s3545_s1 + $0xa8] sm:$0xff]  ;;  %v2960_v8 = vsub.s32 0, %v715_v6  ;;  %v720_v10 = vsub.s32 1, %v715_v6 }
  0x16   : > { %v626_v31 = vld [vmem:[%s3545_s1 + $0xb8] sm:$0xff]  ;;  %v2453_v32 = vpack.c.bf16 %v621_v29, %v619_v28  ;;  %v623_v34 = vld [vmem:[%s3545_s1 + $0xa0] sm:$0xff]  ;;  %v625_v35 = vld [vmem:[%s3545_s1 + $0xb0] sm:$0xff] }
  0x17   : > { %2442 = vmatpush1.bf16.msra.mxu0 %v2441_v14  ;;  %v2455_v33 = vpack.c.bf16 %v626_v31, %v624_v30  ;;  %v628_v36 = vld [vmem:[%s3545_s1 + $0xc8] sm:$0xff]  ;;  %v630_v37 = vld [vmem:[%s3545_s1 + $0xd8] sm:$0xff]  ;;  %v2457_v38 = vpack.c.bf16 %v625_v35, %v623_v34  ;;  %v627_v40 = vld [vmem:[%s3545_s1 + $0xc0] sm:$0xff] }
  0x18   : > { %2444 = vmatprep.subr.bf16.mxu0 %v2443_v15  ;;  %v2459_v39 = vpack.c.bf16 %v630_v37, %v628_v36  ;;  %v629_v41 = vld [vmem:[%s3545_s1 + $0xd0] sm:$0xff]  ;;  %v632_v42 = vld [vmem:[%s3545_s1 + $0xe8] sm:$0xff]  ;;  %v634_v43 = vld [vmem:[%s3545_s1 + $0xf8] sm:$0xff] }
  0x19   : > { %v2461_v44 = vpack.c.bf16 %v629_v41, %v627_v40  ;;  %v2463_v45 = vpack.c.bf16 %v634_v43, %v632_v42  ;;  %v631_v46 = vld [vmem:[%s3545_s1 + $0xe0] sm:$0xff]  ;;  %v633_v47 = vld [vmem:[%s3545_s1 + $0xf0] sm:$0xff]  ;;  %v602_v50 = vld [vmem:[%s2915_s26 + $0x8] sm:$0xff] }
  0x1a   : > { %v2465_v48 = vpack.c.bf16 %v633_v47, %v631_v46  ;;  %v601_v49 = vld [vmem:[%s2915_s26] sm:$0xff]  ;;  %v2015_v3 = vld [vmem:[%s3524_s4 + $0x148] sm:$0xff]  ;;  %v2032_v11 = vld [vmem:[%s3524_s4 + $0x1d0] sm:$0xff] }
  0x1b   : > { %2446 = vmatpush1.bf16.msra.mxu0 %v2445_v20  ;;  %v2014_v2 = vld [vmem:[%s3524_s4 + $0x140] sm:$0xff]  ;;  %v2033_v12 = vld [vmem:[%s3524_s4 + $0x1d8] sm:$0xff]  ;;  %v2016_v14 = vld [vmem:[%s3524_s4 + $0x150] sm:$0xff] }
  0x1c   : > { %2448 = vmatprep.subr.bf16.mxu0 %v2447_v21  ;;  %v2477_v4 = vpack.c.bf16 %v2015_v3, %v2014_v2  ;;  %v712_v9 = vld [vmem:[%s3547_s21] sm:$0x3]  ;;  %v2479_v13 = vpack.c.bf16 %v2033_v12, %v2032_v11  ;;  %v2017_v15 = vld [vmem:[%s3524_s4 + $0x158] sm:$0xff]  ;;  %s3548_s21 = sld [smem:[#allocation6_spill]]  ;;  %v2035_v21 = vld [vmem:[%s3524_s4 + $0x1e8] sm:$0xff] }
  0x1d   : > { %v2481_v17 = vpack.c.bf16 %v2017_v15, %v2016_v14  ;;  %v717_v18 = vrot.slane %v712_v9, %v2960_v8  ;;  %v721_v19 = vrot.slane %v712_v9, %v720_v10  ;;  %v2034_v20 = vld [vmem:[%s3524_s4 + $0x1e0] sm:$0xff]  ;;  %v2019_v25 = vld [vmem:[%s3524_s4 + $0x168] sm:$0xff]  ;;  %v2036_v35 = vld [vmem:[%s3524_s4 + $0x1f0] sm:$0xff] }
  0x1e   : > { %2478 = vmatpush3.bf16.msra.mxu1 %v2477_v4  ;;  %v2483_v23 = vpack.c.bf16 %v2035_v21, %v2034_v20  ;;  %v2018_v24 = vld [vmem:[%s3524_s4 + $0x160] sm:$0xff]  ;;  %v2037_v36 = vld [vmem:[%s3524_s4 + $0x1f8] sm:$0xff]  ;;  %v2020_v40 = vld [vmem:[%s3524_s4 + $0x170] sm:$0xff] }
  0x1f   : > { %2450 = vmatpush1.bf16.msra.mxu0 %v2449_v26  ;;  %2480 = vmatprep.subr.bf16.mxu1 %v2479_v13  ;;  %v2485_v28 = vpack.c.bf16 %v2019_v25, %v2018_v24  ;;  %v2042_v31 = vld [vmem:[%s3524_s4 + $0x220] sm:$0xff]  ;;  %v2021_v41 = vld [vmem:[%s3524_s4 + $0x178] sm:$0xff]  ;;  %v2044_v47 = vld [vmem:[%s3524_s4 + $0x230] sm:$0xff] }
  0x20   : > { %2452 = vmatprep.subr.bf16.mxu0 %v2451_v27  ;;  %v2022_v54 = vld [vmem:[%s3524_s4 + $0x180] sm:$0xff]  ;;  %v2023_v57 = vld [vmem:[%s3524_s4 + $0x188] sm:$0xff]  ;;  %v2040_v63 = vld [vmem:[%s3524_s4 + $0x210] sm:$0xff] }
  0x21   : > { %v2493_v61 = vpack.c.bf16 %v2023_v57, %v2022_v54  ;;  %v2041_v0 = vld [vmem:[%s3524_s4 + $0x218] sm:$0xff]  ;;  %v2024_v5 = vld [vmem:[%s3524_s4 + $0x190] sm:$0xff]  ;;  %v820_v11 = vld [vmem:[%s3524_s4 + $0x88] sm:$0xff] }
  0x22   : > { %v728_v16 = vld [vmem:[%s3548_s21] sm:$0x3]  ;;  %2482 = vmatpush3.bf16.msra.mxu1 %v2481_v17  ;;  %s2693_s21 = smov 16   ;;  %v2495_v4 = vpack.c.bf16 %v2041_v0, %v2040_v63  ;;  %v2025_v6 = vld [vmem:[%s3524_s4 + $0x198] sm:$0xff]  ;;  %v836_v21 = vld [vmem:[%s3524_s4 + $0x108] sm:$0xff] }
  0x23   : > { %2454 = vmatpush1.bf16.msra.mxu0 %v2453_v32  ;;  %v733_v22 = vrot.slane %v728_v16, %v2960_v8  ;;  %v737_v27 = vrot.slane %v728_v16, %v720_v10  ;;  %2484 = vmatprep.subr.bf16.mxu1 %v2483_v23  ;;  %v2043_v32 = vld [vmem:[%s3524_s4 + $0x228] sm:$0xff]  ;;  %v2497_v9 = vpack.c.bf16 %v2025_v6, %v2024_v5  ;;  %v819_v10 = vld [vmem:[%s3524_s4 + $0x80] sm:$0xff]  ;;  %v2066_v52 = vld [vmem:[%s3524_s4 + $0x2d0] sm:$0xff] }
  0x24   : > { %2456 = vmatprep.subr.bf16.mxu0 %v2455_v33  ;;  %v2500_v34 = vpack.c.bf16 %v2043_v32, %v2042_v31  ;;  %v2505_v13 = vpack.c.bf16 %v820_v11, %v819_v10  ;;  %v835_v20 = vld [vmem:[%s3524_s4 + $0x100] sm:$0xff]  ;;  %v2065_v32 = vld [vmem:[%s3524_s4 + $0x2c8] sm:$0xff]  ;;  %v2067_v53 = vld [vmem:[%s3524_s4 + $0x2d8] sm:$0xff] }
  0x25   : > { %v2064_v31 = vld [vmem:[%s3524_s4 + $0x2c0] sm:$0xff]  ;;  %v824_v63 = vld [vmem:[%s3524_s4 + $0xa8] sm:$0xff] }
  0x26   : > { %2486 = vmatpush3.bf16.msra.mxu1 %v2485_v28  ;;  %v838_v28 = vld [vmem:[%s3524_s4 + $0x118] sm:$0xff]  ;;  %v2068_v6 = vld [vmem:[%s3524_s4 + $0x2e0] sm:$0xff] }
  0x27   : > { %2458 = vmatpush1.bf16.msra.mxu0 %v2457_v38  ;;  %v2691_v38 = vmov 0.0|0.0  }
  0x28   : > { %2460 = vmatprep.subr.bf16.mxu0 %v2459_v39  ;;  %v2487_v39 = vpack.c.bf16 %v2037_v36, %v2036_v35  ;;  %v822_v35 = vld [vmem:[%s3524_s4 + $0x98] sm:$0xff] }
  0x2a   : > { %2488 = vmatprep.subr.bf16.mxu1 %v2487_v39 }
  0x2b   : > { %2462 = vmatpush1.bf16.msra.mxu0 %v2461_v44  ;;  %v2489_v44 = vpack.c.bf16 %v2021_v41, %v2020_v40 }
  0x2c   : > { %2464 = vmatprep.subr.bf16.mxu0 %v2463_v45 }
  0x2d   : > { %2490 = vmatpush3.bf16.msra.mxu1 %v2489_v44 }
  0x2e   : > { %2492 = vmatprep.subr.bf16.mxu1 %v2491_v56 }
  0x2f   : > { %2466 = vmatpush1.bf16.msra.mxu0 %v2465_v48  ;;  %v2045_v48 = vld [vmem:[%s3524_s4 + $0x238] sm:$0xff] }
  0x30   : > { %2499 = vmatprep.subr.bf16.mxu0 %v2691_v38  ;;  %v2503_v51 = vpack.c.bf16 %v2045_v48, %v2044_v47  ;;  %v2543_v48 = vpack.c.bf16 %v2065_v32, %v2064_v31  ;;  %v2055_v31 = vld [vmem:[%s3524_s4 + $0x278] sm:$0xff] }
  0x31   : > { %2494 = vmatpush3.bf16.msra.mxu1 %v2493_v61 }
  0x32   : > { %700 = vmatmul.mubr.f32.vlgmr.msra.gmra.mrb[0].mxu0 %v601_v49  ;;  %2496 = vmatprep.subr.bf16.mxu1 %v2495_v4 }
  0x33   : > { %705 = vmatprep.mubr.f32.mxu0 %v2690_v7  ;;  %2501 = vmatpush3.bf16.msra.mxu0 %v2500_v34  ;;  %v821_v34 = vld [vmem:[%s3524_s4 + $0x90] sm:$0xff] }
  0x34   : > { %2502 = vmatprep.subr.bf16.mxu0 %v2691_v38 }
  0x35   : > { %2498 = vmatpush3.bf16.msra.mxu1 %v2497_v9  ;;  %v2069_v9 = vld [vmem:[%s3524_s4 + $0x2e8] sm:$0xff] }
  0x36   : > { %706 = vmatmul.mubr.f32.gmra.mrb[2].mxu0 %v602_v50  ;;  %2506 = vmatprep.subr.bf16.mxu1 %v2505_v13  ;;  %v808_v13 = vld [vmem:[%s3524_s4 + $0x28] sm:$0xff] }
  0x37   : > { %2286 = vmatprep.mubr.msk.f32.mxu0 %vm2692_vm2, %v2690_v7  ;;  %2504 = vmatpush3.bf16.msra.mxu0 %v2503_v51 }
  0x38   : > { %2537 = vmatprep.subr.bf16.mxu0 %v2691_v38 }
 0x105   : > { %v701_v26 = vpop.f32.mrb[0].mxu0 }
 0x106   : > { %v724_v29 = vmul.f32 %v717_v18, %v701_v26  ;;  %v703_v30 = vpop.f32.mrb[1].mxu0  ;;  %v2538_v26 = vpack.c.bf16 %v836_v21, %v835_v20  ;;  %v2070_v21 = vld [vmem:[%s3524_s4 + $0x2f0] sm:$0xff] }
 0x107   : > { %v725_v33 = vmul.f32 %v721_v19, %v703_v30  ;;  %v804_v30 = vld [vmem:[%s3524_s4 + $0x8] sm:$0xff] }
 0x108   : > { %v740_v37 = vadd.f32 %v733_v22, %v724_v29  ;;  %v803_v29 = vld [vmem:[%s3524_s4] sm:$0xff] }
 0x109   : > { %v707_v42 = vpop.f32.mrb[2].mxu0  ;;  %v741_v43 = vadd.f32 %v737_v27, %v725_v33  ;;  %v2507_v51 = vpack.c.bf16 %v804_v30, %v803_v29  ;;  %v2054_v30 = vld [vmem:[%s3524_s4 + $0x270] sm:$0xff] }
 0x10a   : > { %v726_v45 = vmul.f32 %v717_v18, %v707_v42  ;;  %v709_v46 = vpop.f32.mrb[3].mxu0  ;;  %v744_v55 = vmax.f32 %v740_v37, 0.0 }
 0x10b   : > { %v727_v49 = vmul.f32 %v721_v19, %v709_v46  ;;  %v745_v50 = vmax.f32 %v741_v43, 0.0 }
 0x10c   : > { %v742_v58 = vadd.f32 %v733_v22, %v726_v45  ;;  %v761_v1 = vrot.slane %v744_v55, 7  ;;  %v2509_v55 = vpack.c.bf16 %v822_v35, %v821_v34  ;;  %v2073_v34 = vld [vmem:[%s3524_s4 + $0x308] sm:$0xff] }
 0x10d   : > { %v762_v59 = vrot.slane %v745_v50, 7  ;;  %v743_v60 = vadd.f32 %v737_v27, %v727_v49  ;;  %v837_v27 = vld [vmem:[%s3524_s4 + $0x110] sm:$0xff]  ;;  %v2048_v49 = vld [vmem:[%s3524_s4 + $0x240] sm:$0xff]  ;;  %v2049_v50 = vld [vmem:[%s3524_s4 + $0x248] sm:$0xff] }
 0x10e   : > { %v746_v2 = vmax.f32 %v742_v58, 0.0  ;;  %v2541_v41 = vpack.c.bf16 %v838_v28, %v837_v27  ;;  %v805_v58 = vld [vmem:[%s3524_s4 + $0x10] sm:$0xff]  ;;  %v2545_v61 = vpack.c.bf16 %v2049_v50, %v2048_v49  ;;  %v827_v27 = vld [vmem:[%s3524_s4 + $0xc0] sm:$0xff]  ;;  %v828_v28 = vld [vmem:[%s3524_s4 + $0xc8] sm:$0xff] }
 0x10f   : > { %765 = vrot.lane.b32.xlu1 %v762_v59, %s2693_s21  ;;  %v747_v62 = vmax.f32 %v743_v60, 0.0  ;;  %v806_v59 = vld [vmem:[%s3524_s4 + $0x18] sm:$0xff]  ;;  %v2521_v35 = vpack.c.bf16 %v828_v28, %v827_v27  ;;  %v813_v49 = vld [vmem:[%s3524_s4 + $0x50] sm:$0xff] }
 0x110   : > { %v784_v12 = vrot.slane %v746_v2, 7  ;;  %v2050_v2 = vld [vmem:[%s3524_s4 + $0x250] sm:$0xff]  ;;  %v2511_v5 = vpack.c.bf16 %v806_v59, %v805_v58  ;;  %v814_v50 = vld [vmem:[%s3524_s4 + $0x58] sm:$0xff]  ;;  %v2076_v58 = vld [vmem:[%s3524_s4 + $0x320] sm:$0xff] }
 0x111   : > { %v785_v3 = vrot.slane %v747_v62, 7  ;;  %v823_v62 = vld [vmem:[%s3524_s4 + $0xa0] sm:$0xff]  ;;  %v2077_v59 = vld [vmem:[%s3524_s4 + $0x328] sm:$0xff]  ;;  %v2082_v27 = vld [vmem:[%s3524_s4 + $0x350] sm:$0xff] }
 0x112   : > { %v2513_v11 = vpack.c.bf16 %v824_v63, %v823_v62  ;;  %v816_v62 = vld [vmem:[%s3524_s4 + $0x68] sm:$0xff]  ;;  %v2083_v28 = vld [vmem:[%s3524_s4 + $0x358] sm:$0xff] }
 0x113   : > { %763 = vrot.lane.b32.xlu1 %v761_v1, %s2693_s21  ;;  %788 = vrot.lane.b32.xlu0 %v785_v3, %s2693_s21  ;;  %v2547_v1 = vpack.c.bf16 %v2067_v53, %v2066_v52  ;;  %v2051_v3 = vld [vmem:[%s3524_s4 + $0x258] sm:$0xff]  ;;  %v831_v52 = vld [vmem:[%s3524_s4 + $0xe0] sm:$0xff] }
 0x114   : > { %v832_v53 = vld [vmem:[%s3524_s4 + $0xe8] sm:$0xff] }
 0x117   : > { %786 = vrot.lane.b32.xlu0 %v784_v12, %s2693_s21  ;;  %v807_v12 = vld [vmem:[%s3524_s4 + $0x20] sm:$0xff]  ;;  %s600_s21 = scalar_lea.vmem %s3539_s19, %s2009_s20 }
 0x118   : > { %v2515_v20 = vpack.c.bf16 %v808_v13, %v807_v12  ;;  %v818_v12 = vld [vmem:[%s3524_s4 + $0x78] sm:$0xff] }
 0x181   : > { %v766_v14 = vpop.permute.xlu1 %765 }
 0x182   : > { %776 = vst.msk [vmem:[#allocation2 + $0x10] sm:$0xfe] %vm775_vm3, %v766_v14 }
 0x183   : > { %781 = vst.msk [vmem:[#allocation2 + $0x28] sm:$0x1] %vm780_vm4, %v766_v14 }
 0x185   : > { %v764_v15 = vpop.permute.xlu1 %763  ;;  %v789_v16 = vpop.permute.xlu0 %788 }
 0x186   : > { %v768_v17 = vsel %vm767_vm5, %v764_v15, %v766_v14  ;;  %773 = vst.msk [vmem:[#allocation2] sm:$0xfe] %vm772_vm6, %v764_v15  ;;  %v2549_v14 = vpack.c.bf16 %v2051_v3, %v2050_v2  ;;  %v2567_v2 = vpack.c.bf16 %v2077_v59, %v2076_v58  ;;  %v2060_v3 = vld [vmem:[%s3524_s4 + $0x2a0] sm:$0xff]  ;;  %v1425_v58 = vld [vmem:[%s3527_s7 + $0x70] sm:$0xff]  ;;  %v1426_v59 = vld [vmem:[%s3527_s7 + $0x78] sm:$0xff] }
 0x187   : > { %778 = vst.msk [vmem:[#allocation2 + $0x18] sm:$0x1] %vm777_vm7, %v764_v15  ;;  %774 = vst [vmem:[#allocation2 + $0x8] sm:$0xfe] %v768_v17  ;;  %v825_v15 = vld [vmem:[%s3524_s4 + $0xb0] sm:$0xff] }
 0x188   : > { %796 = vst.msk [vmem:[#allocation2 + $0x28] sm:$0xfe] %vm775_vm3, %v789_v16  ;;  %779 = vst [vmem:[#allocation2 + $0x20] sm:$0x1] %v768_v17  ;;  %v2551_v17 = vpack.c.bf16 %v2069_v9, %v2068_v6  ;;  %v2078_v6 = vld [vmem:[%s3524_s4 + $0x330] sm:$0xff]  ;;  %v2079_v9 = vld [vmem:[%s3524_s4 + $0x338] sm:$0xff] }
 0x189   : > { %799 = vst.msk [vmem:[#allocation2 + $0x40] sm:$0x1] %vm780_vm4, %v789_v16  ;;  %v787_v18 = vpop.permute.xlu0 %786  ;;  %v802_v4 = vld [vmem:[#allocation2 + $0x10] sm:$0xff] }
 0x18a   : > { %v790_v19 = vsel %vm767_vm5, %v787_v18, %v789_v16  ;;  %794 = vst.msk [vmem:[#allocation2 + $0x18] sm:$0xfe] %vm772_vm6, %v787_v18  ;;  %v826_v16 = vld [vmem:[%s3524_s4 + $0xb8] sm:$0xff] }
 0x18b   : > { %797 = vst.msk [vmem:[#allocation2 + $0x30] sm:$0x1] %vm777_vm7, %v787_v18  ;;  %795 = vst [vmem:[#allocation2 + $0x20] sm:$0xfe] %v790_v19  ;;  %v2052_v18 = vld [vmem:[%s3524_s4 + $0x260] sm:$0xff] }
 0x18c   : > { %798 = vst [vmem:[#allocation2 + $0x38] sm:$0x1] %v790_v19  ;;  %v2053_v19 = vld [vmem:[%s3524_s4 + $0x268] sm:$0xff] }
 0x18e   : > { %v1186_v36 = vld [vmem:[#allocation2 + $0x8] sm:$0xfe] }
 0x18f   : > { %v841_v22 = vld [vmem:[#allocation2 + $0x28] sm:$0xfe]  ;;  %v1189_v40 = vld [vmem:[#allocation2 + $0x20] sm:$0x1]  ;;  %v1237_v56 = vrot.slane %v1186_v36, 1 }
 0x190   : > { %v844_v23 = vld [vmem:[#allocation2 + $0x40] sm:$0x1]  ;;  %v895_v24 = vrot.slane %v841_v22, 1  ;;  %v1238_v57 = vrot.slane %v1189_v40, 1  ;;  %v801_v0 = vld [vmem:[#allocation2 + $0x8] sm:$0xff]  ;;  %v2071_v22 = vld [vmem:[%s3524_s4 + $0x2f8] sm:$0xff] }
 0x191   : > { %v896_v25 = vrot.slane %v844_v23, 1  ;;  %v839_v37 = vld [vmem:[#allocation2 + $0x18] sm:$0xfe]  ;;  %v2517_v23 = vpack.c.bf16 %v826_v16, %v825_v15  ;;  %v2555_v29 = vpack.c.bf16 %v2071_v22, %v2070_v21  ;;  %v811_v36 = vld [vmem:[%s3524_s4 + $0x40] sm:$0xff]  ;;  %v829_v40 = vld [vmem:[%s3524_s4 + $0xd0] sm:$0xff] }
 0x192   : > { %v842_v39 = vld [vmem:[#allocation2 + $0x30] sm:$0x1]  ;;  %v840_v42 = vld [vmem:[#allocation2 + $0x20] sm:$0xfe]  ;;  %v889_v44 = vrot.slane %v839_v37, 1  ;;  %v1239_v10 = vsel %vm888_vm8, %v1237_v56, %v1238_v57  ;;  %v812_v37 = vld [vmem:[%s3524_s4 + $0x48] sm:$0xff]  ;;  %v2527_v57 = vpack.c.bf16 %v814_v50, %v813_v49 }
 0x193   : > { %v897_v33 = vsel %vm888_vm8, %v895_v24, %v896_v25  ;;  %v843_v43 = vld [vmem:[#allocation2 + $0x38] sm:$0x1]  ;;  %v890_v45 = vrot.slane %v842_v39, 1  ;;  %v892_v46 = vrot.slane %v840_v42, 1  ;;  %v809_v24 = vld [vmem:[%s3524_s4 + $0x30] sm:$0xff]  ;;  %v2557_v39 = vpack.c.bf16 %v2055_v31, %v2054_v30  ;;  %v2080_v21 = vld [vmem:[%s3524_s4 + $0x340] sm:$0xff] }
 0x194   : > { %2287 = vmatmul.mubr.msk.f32.vlgmr.msra.gmra.mrb[4].mxu0 %vm750_vm0, %v897_v33  ;;  %v893_v47 = vrot.slane %v843_v43, 1  ;;  %v810_v25 = vld [vmem:[%s3524_s4 + $0x38] sm:$0xff]  ;;  %v2072_v33 = vld [vmem:[%s3524_s4 + $0x300] sm:$0xff]  ;;  %v2062_v15 = vld [vmem:[%s3524_s4 + $0x2b0] sm:$0xff] }
 0x195   : > { %2539 = vmatpush3.bf16.msra.mxu0 %v2538_v26  ;;  %2297 = vmatprep.mubr.msk.f32.mxu0 %vm2692_vm2, %v2690_v7  ;;  %v891_v60 = vsel %vm888_vm8, %v889_v44, %v890_v45  ;;  %v2553_v26 = vpack.c.bf16 %v2053_v19, %v2052_v18  ;;  %v2519_v32 = vpack.c.bf16 %v810_v25, %v809_v24  ;;  %v2056_v43 = vld [vmem:[%s3524_s4 + $0x280] sm:$0xff]  ;;  %v2057_v44 = vld [vmem:[%s3524_s4 + $0x288] sm:$0xff]  ;;  %v2059_v56 = vld [vmem:[%s3524_s4 + $0x298] sm:$0xff] }
 0x196   : > { %2540 = vmatprep.subr.bf16.mxu0 %v2691_v38  ;;  %v894_v54 = vsel %vm888_vm8, %v892_v46, %v893_v47  ;;  %v2559_v42 = vpack.c.bf16 %v2073_v34, %v2072_v33  ;;  %v2523_v45 = vpack.c.bf16 %v812_v37, %v811_v36  ;;  %v2074_v46 = vld [vmem:[%s3524_s4 + $0x310] sm:$0xff]  ;;  %v2075_v47 = vld [vmem:[%s3524_s4 + $0x318] sm:$0xff]  ;;  %v1185_v18 = vld [vmem:[#allocation2] sm:$0xfe] }
 0x197   : > { %966 = vmatprep.mubr.f32.mxu1 %v894_v54  ;;  %v2563_v54 = vpack.c.bf16 %v2075_v47, %v2074_v46  ;;  %v2063_v16 = vld [vmem:[%s3524_s4 + $0x2b8] sm:$0xff]  ;;  %v2081_v22 = vld [vmem:[%s3524_s4 + $0x348] sm:$0xff]  ;;  %v800_v25 = vld [vmem:[#allocation2] sm:$0xff] }
 0x198   : > { %967 = vmatmul.mubr.f32.vlgmr.msra.gmra.mrb[0].mxu1 %v891_v60  ;;  %v2529_v60 = vpack.c.bf16 %v832_v53, %v831_v52  ;;  %v1188_v19 = vld [vmem:[#allocation2 + $0x18] sm:$0x1]  ;;  %v1187_v30 = vld [vmem:[#allocation2 + $0x10] sm:$0xfe]  ;;  %v1190_v31 = vld [vmem:[#allocation2 + $0x28] sm:$0x1] }
 0x199   : > { %2542 = vmatpush3.bf16.msra.mxu0 %v2541_v41  ;;  %2508 = vmatpush3.bf16.msra.mxu1 %v2507_v51  ;;  %v830_v41 = vld [vmem:[%s3524_s4 + $0xd8] sm:$0xff]  ;;  %v2561_v51 = vpack.c.bf16 %v2057_v44, %v2056_v43  ;;  %v1235_v24 = vrot.slane %v1188_v19, 1  ;;  %v1240_v33 = vrot.slane %v1187_v30, 1  ;;  %v1241_v34 = vrot.slane %v1190_v31, 1  ;;  %v1411_v36 = vld [vmem:[%s3527_s7] sm:$0xff]  ;;  %v1412_v37 = vld [vmem:[%s3527_s7 + $0x8] sm:$0xff] }
 0x19a   : > { %2544 = vmatprep.subr.bf16.mxu0 %v2543_v48  ;;  %1109 = vmatprep.mubr.f32.mxu1 %v801_v0  ;;  %v2525_v48 = vpack.c.bf16 %v830_v41, %v829_v40  ;;  %v833_v0 = vld [vmem:[%s3524_s4 + $0xf0] sm:$0xff]  ;;  %v1414_v41 = vld [vmem:[%s3527_s7 + $0x18] sm:$0xff]  ;;  %v1415_v43 = vld [vmem:[%s3527_s7 + $0x20] sm:$0xff] }
 0x19b   : > { %2510 = vmatprep.subr.bf16.mxu1 %v2509_v55  ;;  %v2058_v55 = vld [vmem:[%s3524_s4 + $0x290] sm:$0xff]  ;;  %v1416_v44 = vld [vmem:[%s3527_s7 + $0x28] sm:$0xff]  ;;  %v1418_v47 = vld [vmem:[%s3527_s7 + $0x38] sm:$0xff] }
 0x19c   : > { %2298 = vmatmul.mubr.msk.f32.vlgmr.msra.gmra.mrb[4].mxu0 %vm750_vm0, %v802_v4  ;;  %v2565_v63 = vpack.c.bf16 %v2059_v56, %v2058_v55  ;;  %v2061_v4 = vld [vmem:[%s3524_s4 + $0x2a8] sm:$0xff]  ;;  %v1413_v40 = vld [vmem:[%s3527_s7 + $0x10] sm:$0xff]  ;;  %v1419_v49 = vld [vmem:[%s3527_s7 + $0x40] sm:$0xff] }
 0x19d   : > { %2546 = vmatpush3.bf16.msra.mxu0 %v2545_v61  ;;  %1311 = vmatprep.mubr.f32.mxu0 %v1239_v10  ;;  %v815_v61 = vld [vmem:[%s3524_s4 + $0x60] sm:$0xff]  ;;  %v2569_v13 = vpack.c.bf16 %v2061_v4, %v2060_v3  ;;  %v1417_v46 = vld [vmem:[%s3527_s7 + $0x30] sm:$0xff]  ;;  %v1420_v50 = vld [vmem:[%s3527_s7 + $0x48] sm:$0xff] }
 0x19e   : > { %2548 = vmatprep.subr.bf16.mxu0 %v2547_v1  ;;  %2512 = vmatpush3.bf16.msra.mxu1 %v2511_v5  ;;  %v834_v1 = vld [vmem:[%s3524_s4 + $0xf8] sm:$0xff]  ;;  %v2531_v5 = vpack.c.bf16 %v816_v62, %v815_v61  ;;  %v1421_v52 = vld [vmem:[%s3527_s7 + $0x50] sm:$0xff]  ;;  %v1423_v55 = vld [vmem:[%s3527_s7 + $0x60] sm:$0xff] }
 0x19f   : > { %2514 = vmatprep.subr.bf16.mxu1 %v2513_v11  ;;  %v2533_v10 = vpack.c.bf16 %v834_v1, %v833_v0  ;;  %v817_v11 = vld [vmem:[%s3524_s4 + $0x70] sm:$0xff]  ;;  %v1422_v53 = vld [vmem:[%s3527_s7 + $0x58] sm:$0xff]  ;;  %v1424_v56 = vld [vmem:[%s3527_s7 + $0x68] sm:$0xff] }
 0x1a0   : > { %v1498_v61 = vld [vmem:[%s3528_s8] sm:$0xff]  ;;  %v1499_v62 = vld [vmem:[%s3528_s8 + $0x8] sm:$0xff] }
 0x1a1   : > { %2550 = vmatpush3.bf16.msra.mxu0 %v2549_v14  ;;  %v2571_v14 = vpack.c.bf16 %v2079_v9, %v2078_v6  ;;  %v1575_v30 = vld [vmem:[%s3530_s10] sm:$0x3] }
 0x1a2   : > { %2552 = vmatprep.subr.bf16.mxu0 %v2551_v17  ;;  %2516 = vmatpush3.bf16.msra.mxu1 %v2515_v20  ;;  %v2535_v17 = vpack.c.bf16 %v818_v12, %v817_v11  ;;  %v2573_v20 = vpack.c.bf16 %v2063_v16, %v2062_v15  ;;  %v1500_v31 = vld [vmem:[%s3529_s9] sm:$0x1] }
 0x1a3   : > { %2518 = vmatprep.subr.bf16.mxu1 %v2517_v23  ;;  %v1234_v23 = vrot.slane %v1185_v18, 1 }
 0x1a5   : > { %2554 = vmatpush3.bf16.msra.mxu0 %v2553_v26  ;;  %v2576_v26 = vpack.c.bf16 %v2081_v22, %v2080_v21 }
 0x1a6   : > { %2556 = vmatprep.subr.bf16.mxu0 %v2555_v29  ;;  %2520 = vmatpush3.bf16.msra.mxu1 %v2519_v32  ;;  %v1236_v29 = vsel %vm888_vm8, %v1234_v23, %v1235_v24  ;;  %v2579_v32 = vpack.c.bf16 %v2083_v28, %v2082_v27 }
 0x1a7   : > { %2522 = vmatprep.subr.bf16.mxu1 %v2521_v35  ;;  %v1242_v35 = vsel %vm888_vm8, %v1240_v33, %v1241_v34 }
 0x1a9   : > { %2558 = vmatpush3.bf16.msra.mxu0 %v2557_v39  ;;  %v2582_v39 = vpack.c.bf16 %v1412_v37, %v1411_v36  ;;  %v1661_v36 = vld [vmem:[%s3532_s12] sm:$0xff]  ;;  %v1662_v37 = vld [vmem:[%s3532_s12 + $0x8] sm:$0xff] }
 0x1aa   : > { %2560 = vmatprep.subr.bf16.mxu0 %v2559_v42  ;;  %2524 = vmatpush3.bf16.msra.mxu1 %v2523_v45  ;;  %v2585_v42 = vpack.c.bf16 %v1414_v41, %v1413_v40  ;;  %v2588_v45 = vpack.c.bf16 %v1416_v44, %v1415_v43  ;;  %v1741_v40 = vld [vmem:[%s3533_s13] sm:$0xff]  ;;  %v1742_v41 = vld [vmem:[%s3533_s13 + $0x8] sm:$0xff]  ;;  %v1743_v43 = vld [vmem:[%s3533_s13 + $0x10] sm:$0xff] }
 0x1ab   : > { %2526 = vmatprep.subr.bf16.mxu1 %v2525_v48  ;;  %v2591_v48 = vpack.c.bf16 %v1418_v47, %v1417_v46  ;;  %v1744_v44 = vld [vmem:[%s3533_s13 + $0x18] sm:$0xff]  ;;  %v1745_v46 = vld [vmem:[%s3533_s13 + $0x20] sm:$0xff]  ;;  %v1746_v47 = vld [vmem:[%s3533_s13 + $0x28] sm:$0xff] }
 0x1ad   : > { %2562 = vmatpush3.bf16.msra.mxu0 %v2561_v51  ;;  %v2594_v51 = vpack.c.bf16 %v1420_v50, %v1419_v49  ;;  %v1747_v49 = vld [vmem:[%s3533_s13 + $0x30] sm:$0xff]  ;;  %v1748_v50 = vld [vmem:[%s3533_s13 + $0x38] sm:$0xff] }
 0x1ae   : > { %2564 = vmatprep.subr.bf16.mxu0 %v2563_v54  ;;  %2528 = vmatpush3.bf16.msra.mxu1 %v2527_v57  ;;  %v2597_v54 = vpack.c.bf16 %v1422_v53, %v1421_v52  ;;  %v2600_v57 = vpack.c.bf16 %v1424_v56, %v1423_v55  ;;  %v1749_v52 = vld [vmem:[%s3533_s13 + $0x40] sm:$0xff]  ;;  %v1750_v53 = vld [vmem:[%s3533_s13 + $0x48] sm:$0xff]  ;;  %v1751_v55 = vld [vmem:[%s3533_s13 + $0x50] sm:$0xff] }
 0x1af   : > { %2530 = vmatprep.subr.bf16.mxu1 %v2529_v60  ;;  %v2603_v60 = vpack.c.bf16 %v1426_v59, %v1425_v58  ;;  %v1752_v56 = vld [vmem:[%s3533_s13 + $0x58] sm:$0xff]  ;;  %v1753_v58 = vld [vmem:[%s3533_s13 + $0x60] sm:$0xff]  ;;  %v1754_v59 = vld [vmem:[%s3533_s13 + $0x68] sm:$0xff] }
 0x1b1   : > { %2566 = vmatpush3.bf16.msra.mxu0 %v2565_v63  ;;  %v2606_v63 = vpack.c.bf16 %v1499_v62, %v1498_v61  ;;  %v1576_v61 = vld [vmem:[%s3531_s11] sm:$0x1] }
 0x1b2   : > { %2568 = vmatprep.subr.bf16.mxu0 %v2567_v2  ;;  %2532 = vmatpush3.bf16.msra.mxu1 %v2531_v5 }
 0x1b3   : > { %2534 = vmatprep.subr.bf16.mxu1 %v2533_v10 }
 0x1b5   : > { %2570 = vmatpush3.bf16.msra.mxu0 %v2569_v13 }
 0x1b6   : > { %2572 = vmatprep.subr.bf16.mxu0 %v2571_v14  ;;  %2536 = vmatpush3.bf16.msra.mxu1 %v2535_v17  ;;  %v2085_v14 = vld [vmem:[%s3525_s5] ss:$0 sm:$0xff] }
 0x1b7   : > { %2581 = vmatprep.subr.bf16.mxu1 %v2691_v38  ;;  %v2086_v17 = vld [vmem:[%s3526_s6] ss:$0 sm:$0xff] }
 0x1b9   : > { %2574 = vmatpush3.bf16.msra.mxu0 %v2573_v20  ;;  %1110 = vmatmul.mubr.f32.vlgmr.msra.gmra.mrb[2].mxu1 %v800_v25 }
 0x1ba   : > { %2575 = vmatprep.subr.bf16.mxu0 %v2691_v38  ;;  %2343 = vmatprep.mubr.msk.f32.mxu1 %vm2692_vm2, %v2690_v7 }
 0x1bb   : > { %2583 = vmatpush3.bf16.msra.mxu1 %v2582_v39  ;;  %v2609_v39 = vpack.c.bf16 %v1662_v37, %v1661_v36 }
 0x1bc   : > { %1312 = vmatmul.mubr.f32.vlgmr.msra.gmra.mrb[6].mxu0 %v1236_v29  ;;  %2584 = vmatprep.subr.bf16.mxu1 %v2691_v38 }
 0x1bd   : > { %2577 = vmatpush3.bf16.msra.mxu0 %v2576_v26  ;;  %2308 = vmatprep.mubr.msk.f32.mxu0 %vm2692_vm2, %v2690_v7 }
 0x1be   : > { %2578 = vmatprep.subr.bf16.mxu0 %v2691_v38 }
 0x1bf   : > { %2586 = vmatpush3.bf16.msra.mxu1 %v2585_v42  ;;  %v2612_v42 = vpack.c.bf16 %v1742_v41, %v1741_v40  ;;  %v2094_v41 = vld [vmem:[%s3537_s17] ss:$0 sm:$0xff] }
 0x1c0   : > { %2587 = vmatprep.subr.bf16.mxu1 %v2691_v38 }
 0x1c1   : > { %2580 = vmatpush3.bf16.msra.mxu0 %v2579_v32 }
 0x1c2   : > { %2605 = vmatprep.subr.bf16.mxu0 %v2691_v38 }
 0x1c3   : > { %2589 = vmatpush3.bf16.msra.mxu1 %v2588_v45  ;;  %v2615_v45 = vpack.c.bf16 %v1744_v44, %v1743_v43  ;;  %v2095_v43 = vld [vmem:[%s3538_s18] ss:$0 sm:$0xff] }
 0x1c4   : > { %2309 = vmatmul.mubr.msk.f32.vlgmr.msra.gmra.mrb[4].mxu0 %vm750_vm0, %v1242_v35  ;;  %2590 = vmatprep.subr.bf16.mxu1 %v2691_v38  ;;  %v2092_v44 = vld [vmem:[%s3534_s14] ss:$0 sm:$0xff] }
 0x1c5   : > { %2350 = vmatprep.mubr.msk.f32.mxu0 %vm2692_vm2, %v2690_v7  ;;  %2607 = vmatpush3.bf16.msra.mxu0 %v2606_v63 }
 0x1c6   : > { %2353 = vmatprep.subr.mxu0 %v2690_v7 }
 0x1c7   : > { %2592 = vmatpush3.bf16.msra.mxu1 %v2591_v48  ;;  %v2618_v48 = vpack.c.bf16 %v1746_v47, %v1745_v46 }
 0x1c8   : > { %2593 = vmatprep.subr.bf16.mxu1 %v2691_v38 }
 0x1cb   : > { %2595 = vmatpush3.bf16.msra.mxu1 %v2594_v51  ;;  %v2621_v51 = vpack.c.bf16 %v1748_v50, %v1747_v49 }
 0x1cc   : > { %2596 = vmatprep.subr.bf16.mxu1 %v2691_v38 }
 0x1cf   : > { %2598 = vmatpush3.bf16.msra.mxu1 %v2597_v54  ;;  %v2624_v54 = vpack.c.bf16 %v1750_v53, %v1749_v52 }
 0x1d0   : > { %2599 = vmatprep.subr.bf16.mxu1 %v2691_v38 }
 0x1d3   : > { %2601 = vmatpush3.bf16.msra.mxu1 %v2600_v57  ;;  %v2627_v57 = vpack.c.bf16 %v1752_v56, %v1751_v55 }
 0x1d4   : > { %2602 = vmatprep.subr.bf16.mxu1 %v2691_v38 }
 0x1d7   : > { %2604 = vmatpush3.bf16.msra.mxu1 %v2603_v60  ;;  %v2630_v60 = vpack.c.bf16 %v1754_v59, %v1753_v58 }
 0x1d8   : > { %2611 = vmatprep.subr.bf16.mxu1 %v2691_v38 }
 0x26b   : > { %v2131_v0 = vpop.f32.mrb[0].mxu1 }
 0x26c   : > { %v2132_v1 = vpop.f32.mrb[1].mxu1 }
 0x26d   : > { %v2133_v2 = vadd.f32 %v2132_v1, %v2131_v0 }
 0x28c   : > { %v2171_v3 = vpop.f32.mrb[2].mxu1 }
 0x28d   : > { %v2172_v4 = vpop.f32.mrb[3].mxu1 }
 0x28e   : > { %v2173_v5 = vadd.f32 %v2172_v4, %v2171_v3  ;;  %v1844_v4 = vld [vmem:[%s3536_s16] sm:$0xff] }
 0x28f   : > { %v2211_v6 = vpop.f32.mrb[6].mxu0 }
 0x290   : > { %v2212_v9 = vpop.f32.mrb[7].mxu0  ;;  %v2659_v10 = vadd.f32 %v2173_v5, %v2133_v2  ;;  %v1845_v5 = vld [vmem:[%s3536_s16 + $0x8] sm:$0xff] }
 0x291   : > { %v2213_v11 = vadd.f32 %v2212_v9, %v2211_v6  ;;  %v2636_v6 = vpack.c.bf16 %v1845_v5, %v1844_v4  ;;  %v1846_v9 = vld [vmem:[%s3536_s16 + $0x10] sm:$0xff] }
 0x293   : > { %v2660_v12 = vadd.f32 %v2659_v10, %v2213_v11  ;;  %v1847_v10 = vld [vmem:[%s3536_s16 + $0x18] sm:$0xff] }
 0x297   : > { %v1383_v13 = vpop.f32.mrb[4].mxu0 }
 0x298   : > { %v2661_v15 = vadd.f32 %v2660_v12, %v1383_v13  ;;  %v2310_v16 = vpop.f32.mrb[5].mxu0  ;;  %v2639_v12 = vpack.c.bf16 %v1847_v10, %v1846_v9  ;;  %v1848_v13 = vld [vmem:[%s3536_s16 + $0x20] sm:$0xff] }
 0x299   : > { %v1850_v16 = vld [vmem:[%s3536_s16 + $0x30] sm:$0xff] }
 0x29a   : > { %v1395_v18 = vmul.f32 %v2661_v15, %v2085_v14  ;;  %v1849_v14 = vld [vmem:[%s3536_s16 + $0x28] sm:$0xff] }
 0x29b   : > { %v2642_v15 = vpack.c.bf16 %v1849_v14, %v1848_v13 }
 0x29c   : > { %v1403_v19 = vadd.f32 %v2086_v17, %v1395_v18  ;;  %v1852_v18 = vld [vmem:[%s3536_s16 + $0x40] sm:$0xff] }
 0x29e   : > { %v3357_v20 = vmax.f32 %v1403_v19, 0.0  ;;  %v1853_v19 = vld [vmem:[%s3536_s16 + $0x48] sm:$0xff] }
 0x2a0   : > { %v1405_v21 = vrot.slane %v3357_v20, 4 }
 0x2a2   : > { %v1406_v22 = vadd.f32 %v1405_v21, %v3357_v20  ;;  %v2648_v21 = vpack.c.bf16 %v1853_v19, %v1852_v18 }
 0x2a4   : > { %v1407_v23 = vrot.slane %v1406_v22, 2 }
 0x2a6   : > { %v1408_v24 = vadd.f32 %v1407_v23, %v1406_v22  ;;  %v1854_v22 = vld [vmem:[%s3536_s16 + $0x50] sm:$0xff]  ;;  %v1855_v23 = vld [vmem:[%s3536_s16 + $0x58] sm:$0xff] }
 0x2a8   : > { %v1409_v25 = vrot.slane %v1408_v24, 1 }
 0x2aa   : > { %v1410_v26 = vadd.f32 %v1409_v25, %v1408_v24  ;;  %v2651_v24 = vpack.c.bf16 %v1855_v23, %v1854_v22  ;;  %v1856_v25 = vld [vmem:[%s3536_s16 + $0x60] sm:$0xff] }
 0x2ac   : > { %2344 = vmatmul.mubr.f32.vlgmr.msra.gmra.mrb[4].mxu1 %v1410_v26  ;;  %v1857_v26 = vld [vmem:[%s3536_s16 + $0x68] sm:$0xff] }
 0x2ad   : > { %2397 = vmatprep.mubr.msk.f32.mxu1 %vm2692_vm2, %v2690_v7  ;;  %2613 = vmatpush3.bf16.msra.mxu1 %v2612_v42 }
 0x2ae   : > { %2614 = vmatprep.subr.bf16.mxu1 %v2691_v38 }
 0x2b1   : > { %2616 = vmatpush3.bf16.msra.mxu1 %v2615_v45 }
 0x2b2   : > { %2617 = vmatprep.subr.bf16.mxu1 %v2691_v38 }
 0x2b5   : > { %2619 = vmatpush3.bf16.msra.mxu1 %v2618_v48 }
 0x2b6   : > { %2620 = vmatprep.subr.bf16.mxu1 %v2691_v38 }
 0x2b9   : > { %2622 = vmatpush3.bf16.msra.mxu1 %v2621_v51 }
 0x2ba   : > { %2623 = vmatprep.subr.bf16.mxu1 %v2691_v38 }
 0x2bd   : > { %2625 = vmatpush3.bf16.msra.mxu1 %v2624_v54 }
 0x2be   : > { %2626 = vmatprep.subr.bf16.mxu1 %v2691_v38 }
 0x2c1   : > { %2628 = vmatpush3.bf16.msra.mxu1 %v2627_v57 }
 0x2c2   : > { %2629 = vmatprep.subr.bf16.mxu1 %v2691_v38 }
 0x2c5   : > { %2631 = vmatpush3.bf16.msra.mxu1 %v2630_v60 }
 0x2c6   : > { %2632 = vmatprep.subr.bf16.mxu1 %v2691_v38 }
 0x37f   : > { %v1493_v27 = vpop.f32.mrb[4].mxu1 }
 0x380   : > { %v1497_v28 = vmul.f32 0.015625, %v1493_v27  ;;  %v2345_v29 = vpop.f32.mrb[5].mxu1  ;;  %v2654_v27 = vpack.c.bf16 %v1857_v26, %v1856_v25 }
 0x381   : > { %v1859_v29 = vld [vmem:[%s3536_s16 + $0x78] sm:$0xff] }
 0x382   : > { %2351 = vmatmul.mubr.msk.f32.vlgmr.msra.gmra.mrb[8].mxu0 %vm767_vm5, %v1497_v28  ;;  %v1858_v28 = vld [vmem:[%s3536_s16 + $0x70] sm:$0xff] }
 0x383   : > { %2355 = vmatprep.mubr.msk.f32.mxu0 %vm2692_vm2, %v2690_v7  ;;  %2354 = vmatpush3.msk.msra.mxu0 %vm1581_vm9, %v1575_v30  ;;  %v2657_v30 = vpack.c.bf16 %v1859_v29, %v1858_v28 }
 0x384   : > { %2608 = vmatprep.subr.bf16.mxu0 %v2691_v38 }
 0x455   : > { %v1570_v32 = vpop.f32.mrb[8].mxu0 }
 0x456   : > { %v1571_v33 = vadd.f32 %v1570_v32, %v1500_v31  ;;  %v2352_v34 = vpop.f32.mrb[9].mxu0  ;;  %v1755_v31 = vld [vmem:[%s3533_s13 + $0x70] sm:$0xff]  ;;  %v1756_v32 = vld [vmem:[%s3533_s13 + $0x78] sm:$0xff] }
 0x458   : > { %v1574_v35 = vmax.f32 %v1571_v33, 0.0  ;;  %v2633_v33 = vpack.c.bf16 %v1756_v32, %v1755_v31 }
 0x45a   : > { %2356 = vmatmul.mubr.msk.f32.vlgmr.msra.gmra.mrb[10].mxu0 %vm1577_vm10, %v1574_v35  ;;  %2634 = vmatpush3.bf16.msra.mxu1 %v2633_v33 }
 0x45b   : > { %2362 = vmatprep.mubr.msk.f32.mxu0 %vm2692_vm2, %v2690_v7  ;;  %2610 = vmatpush3.bf16.msra.mxu0 %v2609_v39 }
 0x45c   : > { %2635 = vmatprep.subr.bf16.mxu0 %v2691_v38 }
 0x52d   : > { %v1651_v62 = vpop.f32.mrb[10].mxu0 }
 0x52e   : > { %v1652_v63 = vadd.f32 %v1651_v62, %v1576_v61  ;;  %v2357_v0 = vpop.f32.mrb[11].mxu0 }
 0x530   : > { %v2090_v1 = vmul.f32 -1.442695, %v1652_v63 }
 0x532   : > { %2678 = vpow2.f32 %v2090_v1 }
 0x53c   : > { %v2679_v2 = vpop.eup %2678 }
 0x53d   : > { %v1658_v3 = vadd.f32 1.0, %v2679_v2 }
 0x53f   : > { %2680 = vrcp.f32 %v1658_v3 }
 0x549   : > { %v2681_v11 = vpop.eup %2680 }
 0x54a   : > { %2363 = vmatmul.mubr.msk.f32.vlgmr.msra.gmra.mrb[12].mxu0 %vm767_vm5, %v2681_v11 }
 0x54b   : > { %2637 = vmatpush3.bf16.msra.mxu0 %v2636_v6  ;;  %2432 = vmatprep.mubr.msk.f32.mxu0 %vm2692_vm2, %v2690_v7  ;;  %v1851_v7 = vld [vmem:[%s3536_s16 + $0x38] sm:$0xff] }
 0x54c   : > { %2638 = vmatprep.subr.bf16.mxu0 %v2691_v38  ;;  %v2645_v17 = vpack.c.bf16 %v1851_v7, %v1850_v16 }
 0x54f   : > { %2640 = vmatpush3.bf16.msra.mxu0 %v2639_v12 }
 0x550   : > { %2641 = vmatprep.subr.bf16.mxu0 %v2691_v38 }
 0x553   : > { %2643 = vmatpush3.bf16.msra.mxu0 %v2642_v15 }
 0x554   : > { %2644 = vmatprep.subr.bf16.mxu0 %v2691_v38 }
 0x557   : > { %2646 = vmatpush3.bf16.msra.mxu0 %v2645_v17 }
 0x558   : > { %2647 = vmatprep.subr.bf16.mxu0 %v2691_v38 }
 0x55b   : > { %2649 = vmatpush3.bf16.msra.mxu0 %v2648_v21 }
 0x55c   : > { %2650 = vmatprep.subr.bf16.mxu0 %v2691_v38 }
 0x55f   : > { %2652 = vmatpush3.bf16.msra.mxu0 %v2651_v24 }
 0x560   : > { %2653 = vmatprep.subr.bf16.mxu0 %v2691_v38 }
 0x563   : > { %2655 = vmatpush3.bf16.msra.mxu0 %v2654_v27 }
 0x564   : > { %2656 = vmatprep.subr.bf16.mxu0 %v2691_v38  ;;  %v1843_v38 = vld [vmem:[%s2915_s26 + $0x8] sm:$0xff] }
 0x567   : > { %2658 = vmatpush3.bf16.msra.mxu0 %v2657_v30 }
 0x56a   : > { %2433 = vmatmul.mubr.f32.vlgmr.msra.gmra.mrb[14].mxu0 %v1843_v38 }
 0x61d   : > { %v1732_v34 = vpop.f32.mrb[12].mxu0 }
 0x61e   : > { %v1739_v35 = vrot.slane %v1732_v34, %v2960_v8  ;;  %v2364_v36 = vpop.f32.mrb[13].mxu0 }
 0x620   : > { %v1740_v37 = vmul.f32 %v1739_v35, %v3357_v20  ;;  %v2093_v20 = vld [vmem:[%s3535_s15] ss:$0 sm:$0xff] }
 0x622   : > { %2398 = vmatmul.mubr.f32.vlgmr.msra.gmra.mrb[6].mxu1 %v1740_v37 }
 0x63d   : > { %v1926_v39 = vpop.f32.mrb[14].mxu0 }
 0x63e   : > { %v2434_v40 = vpop.f32.mrb[15].mxu0  ;;  %v1937_v42 = vmul.f32 %v2094_v41, %v1926_v39 }
 0x640   : > { %v1945_v45 = vadd.f32 %v2095_v43, %v1937_v42 }
 0x6f5   : > { %v1823_v8 = vpop.f32.mrb[6].mxu1 }
 0x6f6   : > { %v1834_v46 = vmul.f32 %v2092_v44, %v1823_v8  ;;  %v2399_v47 = vpop.f32.mrb[7].mxu1 }
 0x6f8   : > { %v1842_v48 = vadd.f32 %v2093_v20, %v1834_v46 }
 0x6fa   : > { %v1946_v49 = vadd.f32 %v1945_v45, %v1842_v48 }
 0x6fc   : > { %v1947_v50 = vmax.f32 %v1946_v49, 0.0 }
 0x6fe   : > { %1948 = vst [vmem:[%s600_s21] sm:$0xff] %v1947_v50 }
 0x6ff PF: > { %s29_s0 = sadd.s32 1, %s2688_s0  }
 0x700   : > { %p26_p4 = scmp.ge.s32.totalorder %s29_s0, 4  }
 0x702   :  { %28 = sbr.rel (!%p26_p4) target bundleno = 5 (0x5), region = 128 }

</bundles_post_ra>
